<compile_context>
chip_gen: v7x
topology: tpu7x:2x2x1
jax: 0.10.0
libtpu: 0.0.40
codegen_flags: <defaults>
</compile_context>

<pallas_src>
import math

import jax
import jax.numpy as jnp
from jax.experimental import pallas as pl
from jax.experimental.pallas import tpu as pltpu


def _round_up(x, m):
    return ((x + m - 1) // m) * m


# ----------------------------------------------------------------------------
# Pallas kernel: single-step  relu(patches @ W_bnfolded + bias)
# Full K and full N per step; grid iterates over M tiles only.
# ----------------------------------------------------------------------------
def _matmul_bias_relu_kernel(p_ref, w_ref, b_ref, o_ref):
    acc = jnp.dot(p_ref[...], w_ref[...], preferred_element_type=jnp.float32)
    o_ref[...] = jnp.maximum(acc + b_ref[...], 0.0).astype(o_ref.dtype)


def _pick_tm(m):
    """Full-M tile when small; otherwise largest 16-aligned divisor <= 512."""
    if m <= 512:
        return m
    for cand in range(512, 15, -16):
        if m % cand == 0:
            return cand
    return 16  # m is always padded to a multiple of 16


def fused_matmul_bias_relu(patches, w2d, bias2d, out_dtype):
    """patches (M,K) bf16, w2d (K,N) bf16 (BN scale pre-folded), bias2d (1,N) f32.
    M % 16 == 0, K % 128 == 0, N % 128 == 0 (pre-padded)."""
    m, k = patches.shape
    k2, n = w2d.shape
    assert k == k2 and m % 16 == 0 and k % 128 == 0 and n % 128 == 0

    tm = _pick_tm(m)
    grid = (m // tm,)

    return pl.pallas_call(
        _matmul_bias_relu_kernel,
        out_shape=jax.ShapeDtypeStruct((m, n), out_dtype),
        grid_spec=pltpu.PrefetchScalarGridSpec(
            num_scalar_prefetch=0,
            grid=grid,
            in_specs=[
                pl.BlockSpec((tm, k), lambda i: (i, 0)),   # full-K patch tile
                pl.BlockSpec((k, n), lambda i: (0, 0)),    # full weight, resident
                pl.BlockSpec((1, n), lambda i: (0, 0)),    # bias row
            ],
            out_specs=pl.BlockSpec((tm, n), lambda i: (i, 0)),
        ),
        compiler_params=pltpu.CompilerParams(
            dimension_semantics=("parallel",),
            vmem_limit_bytes=32 * 1024 * 1024,
        ),
    )(patches, w2d, bias2d)


# ----------------------------------------------------------------------------
# Plain-JAX glue: im2col, parameter init, hoisted weight preparation
# ----------------------------------------------------------------------------
def im2col_nhwc(x, k, stride, pad):
    n, h, w, c = x.shape
    xp = jnp.pad(x, ((0, 0), (pad, pad), (pad, pad), (0, 0)))
    oh = (h + 2 * pad - k) // stride + 1
    ow = (w + 2 * pad - k) // stride + 1
    cols = []
    for kh in range(k):
        for kw in range(k):
            cols.append(
                xp[:, kh:kh + stride * oh:stride, kw:kw + stride * ow:stride, :]
            )
    p = jnp.stack(cols, axis=3)  # (n, oh, ow, k*k, c)  -> K order (kh, kw, c)
    return p.reshape(n * oh * ow, k * k * c), oh, ow


def init_conv_bn(key, cin, cout, k):
    kw_key, kb_key = jax.random.split(key, 2)
    fan_in = cin * k * k
    bound = 1.0 / math.sqrt(fan_in)
    return dict(
        w=jax.random.uniform(kw_key, (cout, cin, k, k), jnp.float32, -bound, bound),
        b=jax.random.uniform(kb_key, (cout,), jnp.float32, -bound, bound),
        gamma=jnp.ones((cout,), jnp.float32),
        beta=jnp.zeros((cout,), jnp.float32),
        mean=jnp.zeros((cout,), jnp.float32),
        var=jnp.ones((cout,), jnp.float32),
    )


def prepare_conv_bn(params, k):
    """One-time (outside jit) weight prep: PyTorch layout -> (K,N), BN fold,
    lane/sublane padding, bf16 cast.  Returns (w2d_bf16 (K_pad,N_pad),
    bias_f32 (1,N_pad))."""
    cout, cin = params["w"].shape[0], params["w"].shape[1]
    # (cout, cin, kh, kw) -> (kh, kw, cin, cout) -> (K, cout): matches im2col K order
    w2d = jnp.transpose(params["w"], (2, 3, 1, 0)).reshape(k * k * cin, cout)

    # Fold BN (eval running stats): epilogue in-kernel is just bias + ReLU.
    scale = params["gamma"] / jnp.sqrt(params["var"] + 1e-5)
    bias = params["beta"] + (params["b"] - params["mean"]) * scale
    w2d = w2d * scale[None, :]

    K = k * k * cin
    K_pad = _round_up(K, 128)
    N_pad = _round_up(cout, 128)
    w2d = jnp.pad(w2d, ((0, K_pad - K), (0, N_pad - cout))).astype(jnp.bfloat16)
    bias = jnp.pad(bias, (0, N_pad - cout)).astype(jnp.float32).reshape(1, N_pad)
    return w2d, bias


def conv_bn_relu(x_nhwc, w2d, bias2d, *, cout, k, stride, pad, out_dtype):
    """x_nhwc carries only true channels (no padding).  Returns NHWC with the
    true cout (channel padding is sliced off here, before the next im2col)."""
    n = x_nhwc.shape[0]
    patches, oh, ow = im2col_nhwc(x_nhwc, k, stride, pad)

    M, K = patches.shape
    K_pad = w2d.shape[0]
    M_pad = _round_up(max(M, 16), 16)  # bf16 packs 16 rows per sublane group

    patches = jnp.pad(patches, ((0, M_pad - M), (0, K_pad - K))).astype(jnp.bfloat16)
    out = fused_matmul_bias_relu(patches, w2d, bias2d, out_dtype)
    return out[:M, :cout].reshape(n, oh, ow, cout)


def density_map_forward(x_nchw, w1, b1, w2, b2, w3, b3):
    n, c, h, w = x_nchw.shape
    # Density map depends only on the input shape: one cos value per row,
    # broadcast over n/w/c (no HBM materialization kernel needed).
    half = h // 2  # integer H // 2, matching the PyTorch reference
    rows = jnp.arange(h, dtype=jnp.float32)
    dm_row = jnp.cos(jnp.abs(rows - half) / half * (math.pi / 2.0))
    dm = jnp.broadcast_to(dm_row[None, :, None, None], (n, h, w, c))  # NHWC

    y = conv_bn_relu(dm, w1, b1, cout=64, k=7, stride=4, pad=2,
                     out_dtype=jnp.bfloat16)   # Conv(3->64,k7,s4,p2)+BN+ReLU
    y = conv_bn_relu(y, w2, b2, cout=192, k=3, stride=2, pad=1,
                     out_dtype=jnp.bfloat16)   # Conv(64->192)+BN+(Dropout=id)+ReLU
    y = conv_bn_relu(y, w3, b3, cout=384, k=3, stride=2, pad=1,
                     out_dtype=jnp.float32)    # Conv(192->384)+BN+ReLU
    return jnp.transpose(y, (0, 3, 1, 2))      # NHWC -> NCHW


if __name__ == "__main__":
    key = jax.random.PRNGKey(0)
    kx, k1, k2, k3 = jax.random.split(key, 4)

    # Small deterministic input, NCHW like the PyTorch module (in_channels=3).
    x = jax.random.normal(kx, (2, 3, 16, 16), jnp.float32)

    p1 = init_conv_bn(k1, cin=3, cout=64, k=7)
    p2 = init_conv_bn(k2, cin=64, cout=192, k=3)
    p3 = init_conv_bn(k3, cin=192, cout=384, k=3)

    # One-time weight preprocessing (hoisted out of the traced forward).
    w1, b1 = prepare_conv_bn(p1, k=7)
    w2, b2 = prepare_conv_bn(p2, k=3)
    w3, b3 = prepare_conv_bn(p3, k=3)

    fwd = jax.jit(density_map_forward)
    out = jax.block_until_ready(fwd(x, w1, b1, w2, b2, w3, b3))

    assert out.shape == (2, 384, 1, 1), out.shape
    assert out.dtype == jnp.float32
    assert bool(jnp.all(jnp.isfinite(out)))
    assert bool(jnp.all(out >= 0.0))  # ReLU epilogue

    print("KERNEL_OK")
</pallas_src>

<mosaic_0001>
module attributes {stable_mosaic.version = 11 : i64} {
  func.func @_matmul_bias_relu_kernel(%arg0: i32, %arg1: memref<32x256xbf16, #tpu.memory_space<vmem>>, %arg2: memref<256x128xbf16, #tpu.memory_space<vmem>>, %arg3: memref<1x128xf32, #tpu.memory_space<vmem>>, %arg4: memref<32x128xbf16, #tpu.memory_space<vmem>>) attributes {dimension_semantics = [#tpu.dimension_semantics<parallel>], iteration_bounds = array<i64: 1>, scalar_prefetch = 0 : i64, scratch_operands = 0 : i64, tpu.core_type = #tpu.core_type<tc>, window_params = [{transform_indices = @transform_0, window_bounds = array<i64: 32, 256>}, {pipeline_mode = #tpu.pipeline_mode<synchronous>, transform_indices = @transform_1, window_bounds = array<i64: 256, 128>}, {pipeline_mode = #tpu.pipeline_mode<synchronous>, transform_indices = @transform_2, window_bounds = array<i64: 1, 128>}, {transform_indices = @transform_3, window_bounds = array<i64: 32, 128>}]} {
    %c0 = arith.constant 0 : index
    %c0_0 = arith.constant 0 : index
    %0 = vector.load %arg1[%c0, %c0_0] : memref<32x256xbf16, #tpu.memory_space<vmem>>, vector<32x256xbf16>
    %c0_1 = arith.constant 0 : index
    %c0_2 = arith.constant 0 : index
    %1 = vector.load %arg2[%c0_1, %c0_2] : memref<256x128xbf16, #tpu.memory_space<vmem>>, vector<256x128xbf16>
    %cst = arith.constant dense<0.000000e+00> : vector<32x128xf32>
    %2 = tpu.matmul %0, %1, %cst {dimension_numbers = #tpu.dot_dimension_numbers<[1], [0], [0], [1], [0, 0, 1, 1], [], []>} : vector<32x256xbf16>, vector<256x128xbf16>, vector<32x128xf32> -> vector<32x128xf32>
    %c0_3 = arith.constant 0 : index
    %c0_4 = arith.constant 0 : index
    %3 = vector.load %arg3[%c0_3, %c0_4] : memref<1x128xf32, #tpu.memory_space<vmem>>, vector<1x128xf32>
    %4 = vector.broadcast %3 : vector<1x128xf32> to vector<32x128xf32>
    %5 = arith.addf %2, %4 : vector<32x128xf32>
    %cst_5 = arith.constant 0.000000e+00 : f32
    %6 = vector.broadcast %cst_5 : f32 to vector<32x128xf32>
    %7 = arith.maximumf %5, %6 : vector<32x128xf32>
    %8 = arith.truncf %7 : vector<32x128xf32> to vector<32x128xbf16>
    %c0_6 = arith.constant 0 : index
    %c0_7 = arith.constant 0 : index
    %9 = vector.load %arg4[%c0_6, %c0_7] : memref<32x128xbf16, #tpu.memory_space<vmem>>, vector<32x128xbf16>
    tpu.vector_store %arg4[%c0_6, %c0_7], %8 {strides = array<i32>} : memref<32x128xbf16, #tpu.memory_space<vmem>>, vector<32x128xbf16>,
    return
  }
  func.func @transform_0(%arg0: i32) -> (i32, i32) {
    %c0_i32 = arith.constant 0 : i32
    %c0_i32_0 = arith.constant 0 : i32
    return %arg0, %c0_i32 : i32, i32
  }
  func.func @transform_1(%arg0: i32) -> (i32, i32) {
    %c0_i32 = arith.constant 0 : i32
    %c0_i32_0 = arith.constant 0 : i32
    %c0_i32_1 = arith.constant 0 : i32
    return %c0_i32, %c0_i32_0 : i32, i32
  }
  func.func @transform_2(%arg0: i32) -> (i32, i32) {
    %c0_i32 = arith.constant 0 : i32
    %c0_i32_0 = arith.constant 0 : i32
    %c0_i32_1 = arith.constant 0 : i32
    return %c0_i32, %c0_i32_0 : i32, i32
  }
  func.func @transform_3(%arg0: i32) -> (i32, i32) {
    %c0_i32 = arith.constant 0 : i32
    %c0_i32_0 = arith.constant 0 : i32
    return %arg0, %c0_i32 : i32, i32
  }
}

module attributes {stable_mosaic.version = 11 : i64} {
  func.func @_matmul_bias_relu_kernel(%arg0: i32, %arg1: memref<16x640xbf16, #tpu.memory_space<vmem>>, %arg2: memref<640x256xbf16, #tpu.memory_space<vmem>>, %arg3: memref<1x256xf32, #tpu.memory_space<vmem>>, %arg4: memref<16x256xbf16, #tpu.memory_space<vmem>>) attributes {dimension_semantics = [#tpu.dimension_semantics<parallel>], iteration_bounds = array<i64: 1>, scalar_prefetch = 0 : i64, scratch_operands = 0 : i64, tpu.core_type = #tpu.core_type<tc>, window_params = [{transform_indices = @transform_0, window_bounds = array<i64: 16, 640>}, {pipeline_mode = #tpu.pipeline_mode<synchronous>, transform_indices = @transform_1, window_bounds = array<i64: 640, 256>}, {pipeline_mode = #tpu.pipeline_mode<synchronous>, transform_indices = @transform_2, window_bounds = array<i64: 1, 256>}, {transform_indices = @transform_3, window_bounds = array<i64: 16, 256>}]} {
    %c0 = arith.constant 0 : index
    %c0_0 = arith.constant 0 : index
    %0 = vector.load %arg1[%c0, %c0_0] : memref<16x640xbf16, #tpu.memory_space<vmem>>, vector<16x640xbf16>
    %c0_1 = arith.constant 0 : index
    %c0_2 = arith.constant 0 : index
    %1 = vector.load %arg2[%c0_1, %c0_2] : memref<640x256xbf16, #tpu.memory_space<vmem>>, vector<640x256xbf16>
    %cst = arith.constant dense<0.000000e+00> : vector<16x256xf32>
    %2 = tpu.matmul %0, %1, %cst {dimension_numbers = #tpu.dot_dimension_numbers<[1], [0], [0], [1], [0, 0, 1, 1], [], []>} : vector<16x640xbf16>, vector<640x256xbf16>, vector<16x256xf32> -> vector<16x256xf32>
    %c0_3 = arith.constant 0 : index
    %c0_4 = arith.constant 0 : index
    %3 = vector.load %arg3[%c0_3, %c0_4] : memref<1x256xf32, #tpu.memory_space<vmem>>, vector<1x256xf32>
    %4 = vector.broadcast %3 : vector<1x256xf32> to vector<16x256xf32>
    %5 = arith.addf %2, %4 : vector<16x256xf32>
    %cst_5 = arith.constant 0.000000e+00 : f32
    %6 = vector.broadcast %cst_5 : f32 to vector<16x256xf32>
    %7 = arith.maximumf %5, %6 : vector<16x256xf32>
    %8 = arith.truncf %7 : vector<16x256xf32> to vector<16x256xbf16>
    %c0_6 = arith.constant 0 : index
    %c0_7 = arith.constant 0 : index
    %9 = vector.load %arg4[%c0_6, %c0_7] : memref<16x256xbf16, #tpu.memory_space<vmem>>, vector<16x256xbf16>
    tpu.vector_store %arg4[%c0_6, %c0_7], %8 {strides = array<i32>} : memref<16x256xbf16, #tpu.memory_space<vmem>>, vector<16x256xbf16>,
    return
  }
  func.func @transform_0(%arg0: i32) -> (i32, i32) {
    %c0_i32 = arith.constant 0 : i32
    %c0_i32_0 = arith.constant 0 : i32
    return %arg0, %c0_i32 : i32, i32
  }
  func.func @transform_1(%arg0: i32) -> (i32, i32) {
    %c0_i32 = arith.constant 0 : i32
    %c0_i32_0 = arith.constant 0 : i32
    %c0_i32_1 = arith.constant 0 : i32
    return %c0_i32, %c0_i32_0 : i32, i32
  }
  func.func @transform_2(%arg0: i32) -> (i32, i32) {
    %c0_i32 = arith.constant 0 : i32
    %c0_i32_0 = arith.constant 0 : i32
    %c0_i32_1 = arith.constant 0 : i32
    return %c0_i32, %c0_i32_0 : i32, i32
  }
  func.func @transform_3(%arg0: i32) -> (i32, i32) {
    %c0_i32 = arith.constant 0 : i32
    %c0_i32_0 = arith.constant 0 : i32
    return %arg0, %c0_i32 : i32, i32
  }
}

module attributes {stable_mosaic.version = 11 : i64} {
  func.func @_matmul_bias_relu_kernel(%arg0: i32, %arg1: memref<16x1792xbf16, #tpu.memory_space<vmem>>, %arg2: memref<1792x384xbf16, #tpu.memory_space<vmem>>, %arg3: memref<1x384xf32, #tpu.memory_space<vmem>>, %arg4: memref<16x384xf32, #tpu.memory_space<vmem>>) attributes {dimension_semantics = [#tpu.dimension_semantics<parallel>], iteration_bounds = array<i64: 1>, scalar_prefetch = 0 : i64, scratch_operands = 0 : i64, tpu.core_type = #tpu.core_type<tc>, window_params = [{transform_indices = @transform_0, window_bounds = array<i64: 16, 1792>}, {pipeline_mode = #tpu.pipeline_mode<synchronous>, transform_indices = @transform_1, window_bounds = array<i64: 1792, 384>}, {pipeline_mode = #tpu.pipeline_mode<synchronous>, transform_indices = @transform_2, window_bounds = array<i64: 1, 384>}, {transform_indices = @transform_3, window_bounds = array<i64: 16, 384>}]} {
    %c0 = arith.constant 0 : index
    %c0_0 = arith.constant 0 : index
    %0 = vector.load %arg1[%c0, %c0_0] : memref<16x1792xbf16, #tpu.memory_space<vmem>>, vector<16x1792xbf16>
    %c0_1 = arith.constant 0 : index
    %c0_2 = arith.constant 0 : index
    %1 = vector.load %arg2[%c0_1, %c0_2] : memref<1792x384xbf16, #tpu.memory_space<vmem>>, vector<1792x384xbf16>
    %cst = arith.constant dense<0.000000e+00> : vector<16x384xf32>
    %2 = tpu.matmul %0, %1, %cst {dimension_numbers = #tpu.dot_dimension_numbers<[1], [0], [0], [1], [0, 0, 1, 1], [], []>} : vector<16x1792xbf16>, vector<1792x384xbf16>, vector<16x384xf32> -> vector<16x384xf32>
    %c0_3 = arith.constant 0 : index
    %c0_4 = arith.constant 0 : index
    %3 = vector.load %arg3[%c0_3, %c0_4] : memref<1x384xf32, #tpu.memory_space<vmem>>, vector<1x384xf32>
    %4 = vector.broadcast %3 : vector<1x384xf32> to vector<16x384xf32>
    %5 = arith.addf %2, %4 : vector<16x384xf32>
    %cst_5 = arith.constant 0.000000e+00 : f32
    %6 = vector.broadcast %cst_5 : f32 to vector<16x384xf32>
    %7 = arith.maximumf %5, %6 : vector<16x384xf32>
    %c0_6 = arith.constant 0 : index
    %c0_7 = arith.constant 0 : index
    %8 = vector.load %arg4[%c0_6, %c0_7] : memref<16x384xf32, #tpu.memory_space<vmem>>, vector<16x384xf32>
    tpu.vector_store %arg4[%c0_6, %c0_7], %7 {strides = array<i32>} : memref<16x384xf32, #tpu.memory_space<vmem>>, vector<16x384xf32>,
    return
  }
  func.func @transform_0(%arg0: i32) -> (i32, i32) {
    %c0_i32 = arith.constant 0 : i32
    %c0_i32_0 = arith.constant 0 : i32
    return %arg0, %c0_i32 : i32, i32
  }
  func.func @transform_1(%arg0: i32) -> (i32, i32) {
    %c0_i32 = arith.constant 0 : i32
    %c0_i32_0 = arith.constant 0 : i32
    %c0_i32_1 = arith.constant 0 : i32
    return %c0_i32, %c0_i32_0 : i32, i32
  }
  func.func @transform_2(%arg0: i32) -> (i32, i32) {
    %c0_i32 = arith.constant 0 : i32
    %c0_i32_0 = arith.constant 0 : i32
    %c0_i32_1 = arith.constant 0 : i32
    return %c0_i32, %c0_i32_0 : i32, i32
  }
  func.func @transform_3(%arg0: i32) -> (i32, i32) {
    %c0_i32 = arith.constant 0 : i32
    %c0_i32_0 = arith.constant 0 : i32
    return %arg0, %c0_i32 : i32, i32
  }
}

</mosaic_0001>

<bundles_post_ra>
// kernel: density_map_forward.3
= control target key start
LH: loop header
LB: loop body
LE: loop exit
PB: predicated region body
PF: predicated region fallthrough
CT: control target
= control target key end

     0   :  { %s446_s1 = inlined_call_operand.vmem [shape: bf16[256,128], index: 1, kind: input, shape index: {}]   ;;  %s447_s0 = inlined_call_operand.vmem [shape: bf16[32,256], index: 0, kind: input, shape index: {}]   ;;  %s448_s2 = inlined_call_operand.vmem [shape: f32[1,128], index: 2, kind: input, shape index: {}]   ;;  %s449_s3 = inlined_call_operand.vmem [shape: bf16[32,128], index: 3, kind: output, shape index: {}]  }
   0x1   :  { %v335_v0 = vld [vmem:[%s446_s1 + $0x40] sm:$0xff]   ;;  %v337_v2 = vld [vmem:[%s446_s1 + $0x48] sm:$0xff]   ;;  %v339_v4 = vld [vmem:[%s446_s1 + $0x50] sm:$0xff]  }
   0x2   :  { %v336_v1 = vld [vmem:[%s446_s1] sm:$0xff]   ;;  %291 = vmatprep.subr.bf16.mxu0 %v335_v0  ;;  %319 = vmatprep.subr.bf16.mxu1 %v335_v0  ;;  %v338_v3 = vld [vmem:[%s446_s1 + $0x8] sm:$0xff]   ;;  %v340_v5 = vld [vmem:[%s446_s1 + $0x10] sm:$0xff]  }
   0x3   :  { %292 = vmatpush3.bf16.msra.mxu0 %v336_v1  ;;  %327 = vmatpush3.bf16.msra.mxu1 %v336_v1  ;;  %v341_v6 = vld [vmem:[%s446_s1 + $0x58] sm:$0xff]   ;;  %v343_v8 = vld [vmem:[%s446_s1 + $0x60] sm:$0xff]   ;;  %v345_v10 = vld [vmem:[%s446_s1 + $0x68] sm:$0xff]  }
   0x4   :  { %293 = vmatprep.subr.bf16.mxu0 %v337_v2  ;;  %320 = vmatprep.subr.bf16.mxu1 %v337_v2  ;;  %v342_v7 = vld [vmem:[%s446_s1 + $0x18] sm:$0xff]   ;;  %v344_v9 = vld [vmem:[%s446_s1 + $0x20] sm:$0xff]   ;;  %v346_v13 = vld [vmem:[%s446_s1 + $0x28] sm:$0xff]  }
   0x5   :  { %v353_v11 = vld [vmem:[%s447_s0 + $0x4] ss:$8 sps:$4 sm:$0xff]   ;;  %v356_v12 = vld [vmem:[%s447_s0 + $0x14] ss:$8 sps:$4 sm:$0xff]   ;;  %v351_v18 = vld [vmem:[%s447_s0] ss:$8 sps:$4 sm:$0xff]  }
   0x6   :  { %v347_v14 = vld [vmem:[%s446_s1 + $0x70] sm:$0xff]   ;;  %206 = vmatprep.mubr.bf16.mxu0 %v353_v11  ;;  %214 = vmatprep.mubr.bf16.mxu1 %v356_v12  ;;  %v349_v16 = vld [vmem:[%s446_s1 + $0x78] sm:$0xff]   ;;  %v251_v22 = vld [vmem:[%s448_s2] ss:$0 sm:$0xff] }
   0x7   :  { %294 = vmatpush3.bf16.msra.mxu0 %v338_v3  ;;  %328 = vmatpush3.bf16.msra.mxu1 %v338_v3  ;;  %v348_v15 = vld [vmem:[%s446_s1 + $0x30] sm:$0xff]   ;;  %v350_v17 = vld [vmem:[%s446_s1 + $0x38] sm:$0xff]  }
   0x8   :  { %295 = vmatprep.subr.bf16.mxu0 %v339_v4  ;;  %321 = vmatprep.subr.bf16.mxu1 %v339_v4  ;;  %v354_v19 = vld [vmem:[%s447_s0 + $0x10] ss:$8 sps:$4 sm:$0xff]  }
   0xb   :  { %296 = vmatpush3.bf16.msra.mxu0 %v340_v5  ;;  %329 = vmatpush3.bf16.msra.mxu1 %v340_v5 }
   0xc   :  { %297 = vmatprep.subr.bf16.mxu0 %v341_v6  ;;  %322 = vmatprep.subr.bf16.mxu1 %v341_v6 }
   0xf   :  { %298 = vmatpush3.bf16.msra.mxu0 %v342_v7  ;;  %330 = vmatpush3.bf16.msra.mxu1 %v342_v7 }
  0x10   :  { %299 = vmatprep.subr.bf16.mxu0 %v343_v8  ;;  %323 = vmatprep.subr.bf16.mxu1 %v343_v8 }
  0x13   :  { %300 = vmatpush3.bf16.msra.mxu0 %v344_v9  ;;  %331 = vmatpush3.bf16.msra.mxu1 %v344_v9 }
  0x14   :  { %301 = vmatprep.subr.bf16.mxu0 %v345_v10  ;;  %324 = vmatprep.subr.bf16.mxu1 %v345_v10 }
  0x17   :  { %302 = vmatpush3.bf16.msra.mxu0 %v346_v13  ;;  %332 = vmatpush3.bf16.msra.mxu1 %v346_v13 }
  0x18   :  { %303 = vmatprep.subr.bf16.mxu0 %v347_v14  ;;  %325 = vmatprep.subr.bf16.mxu1 %v347_v14 }
  0x1b   :  { %304 = vmatpush3.bf16.msra.mxu0 %v348_v15  ;;  %333 = vmatpush3.bf16.msra.mxu1 %v348_v15 }
  0x1c   :  { %305 = vmatprep.subr.bf16.mxu0 %v349_v16  ;;  %326 = vmatprep.subr.bf16.mxu1 %v349_v16 }
  0x1f   :  { %306 = vmatpush3.bf16.msra.mxu0 %v350_v17  ;;  %334 = vmatpush3.bf16.msra.mxu1 %v350_v17 }
  0x22   :  { %207 = vmatmul.mubr.bf16.vlgmr.msra.gmra.mrb[0].mxu0 %v351_v18  ;;  %215 = vmatmul.mubr.bf16.vlgmr.msra.gmra.mrb[0].mxu1 %v354_v19 }
  0xf5   :  { %v307_v20 = vpop.f32.mrb[0].mxu0  ;;  %v313_v21 = vpop.f32.mrb[0].mxu1 }
  0xf6   :  { %v308_v23 = vpop.f32.mrb[1].mxu0  ;;  %v314_v24 = vpop.f32.mrb[1].mxu1 }
  0xf7   :  { %v309_v25 = vadd.f32 %v308_v23, %v307_v20  ;;  %v315_v26 = vadd.f32 %v314_v24, %v313_v21  ;;  %v310_v27 = vpop.f32.mrb[2].mxu0  ;;  %v316_v28 = vpop.f32.mrb[2].mxu1 }
  0xf8   :  { %v311_v29 = vpop.f32.mrb[3].mxu0  ;;  %v317_v30 = vpop.f32.mrb[3].mxu1 }
  0xf9   :  { %v209_v31 = vadd.f32 %v309_v25, %v251_v22  ;;  %v217_v32 = vadd.f32 %v315_v26, %v251_v22  ;;  %v312_v33 = vadd.f32 %v311_v29, %v310_v27  ;;  %v318_v34 = vadd.f32 %v317_v30, %v316_v28 }
  0xfb   :  { %v212_v35 = vadd.f32 %v312_v33, %v251_v22  ;;  %v220_v36 = vadd.f32 %v318_v34, %v251_v22  ;;  %v223_v37 = vmax.f32 %v209_v31, 0.0  ;;  %v225_v38 = vmax.f32 %v217_v32, 0.0 }
  0xfd   :  { %v224_v39 = vmax.f32 %v212_v35, 0.0  ;;  %v226_v40 = vmax.f32 %v220_v36, 0.0 }
  0xff   :  { %v283_v41 = vpack.c.bf16 %v224_v39, %v223_v37  ;;  %v288_v42 = vpack.c.bf16 %v226_v40, %v225_v38 }
 0x101   :  { %284 = vst [vmem:[%s449_s3] sm:$0xff] %v283_v41   ;;  %290 = vst [vmem:[%s449_s3 + $0x8] sm:$0xff] %v288_v42  }

// kernel: density_map_forward.4
= control target key start
LH: loop header
LB: loop body
LE: loop exit
PB: predicated region body
PF: predicated region fallthrough
CT: control target
= control target key end

     0   :  { %s1204_s1 = inlined_call_operand.vmem [shape: bf16[640,256], index: 1, kind: input, shape index: {}]   ;;  %s1205_s0 = inlined_call_operand.vmem [shape: bf16[16,640], index: 0, kind: input, shape index: {}]   ;;  %s1206_s2 = inlined_call_operand.vmem [shape: f32[1,256], index: 2, kind: input, shape index: {}]   ;;  %s1207_s3 = inlined_call_operand.vmem [shape: bf16[16,256], index: 3, kind: output, shape index: {}]  }
   0x1   :  { %v792_v0 = vld [vmem:[%s1204_s1 + $0x104] ss:$8 sps:$4 sm:$0xff]   ;;  %v794_v1 = vld [vmem:[%s1204_s1 + $0x100] ss:$8 sps:$4 sm:$0xff]   ;;  %v795_v2 = vld [vmem:[%s1204_s1 + $0x114] ss:$8 sps:$4 sm:$0xff]  }
   0x2   :  { %582 = vmatprep.subr.bf16.mxu0 %v792_v0  ;;  %v797_v3 = vld [vmem:[%s1204_s1 + $0x110] ss:$8 sps:$4 sm:$0xff]   ;;  %v798_v4 = vld [vmem:[%s1204_s1 + $0x124] ss:$8 sps:$4 sm:$0xff]   ;;  %v800_v5 = vld [vmem:[%s1204_s1 + $0x120] ss:$8 sps:$4 sm:$0xff]  }
   0x3   :  { %583 = vmatpush1.bf16.msra.mxu0 %v794_v1  ;;  %v801_v6 = vld [vmem:[%s1204_s1 + $0x134] ss:$8 sps:$4 sm:$0xff]   ;;  %v813_v7 = vld [vmem:[%s1204_s1 + $0x4] ss:$8 sps:$4 sm:$0xff]   ;;  %v815_v8 = vld [vmem:[%s1204_s1] ss:$8 sps:$4 sm:$0xff]  }
   0x4   :  { %584 = vmatprep.subr.bf16.mxu0 %v795_v2  ;;  %v803_v9 = vld [vmem:[%s1204_s1 + $0x130] ss:$8 sps:$4 sm:$0xff]   ;;  %v804_v10 = vld [vmem:[%s1204_s1 + $0x144] ss:$8 sps:$4 sm:$0xff]   ;;  %539 = vmatprep.subr.bf16.mxu1 %v813_v7  ;;  %v819_v11 = vld [vmem:[%s1204_s1 + $0x14] ss:$8 sps:$4 sm:$0xff]  }
   0x5   :  { %540 = vmatpush1.bf16.msra.mxu1 %v815_v8  ;;  %v821_v12 = vld [vmem:[%s1204_s1 + $0x10] ss:$8 sps:$4 sm:$0xff]   ;;  %v806_v13 = vld [vmem:[%s1204_s1 + $0x140] ss:$8 sps:$4 sm:$0xff]   ;;  %v825_v14 = vld [vmem:[%s1204_s1 + $0x24] ss:$8 sps:$4 sm:$0xff]  }
   0x6   :  { %541 = vmatprep.subr.bf16.mxu1 %v819_v11  ;;  %v807_v15 = vld [vmem:[%s1204_s1 + $0x154] ss:$8 sps:$4 sm:$0xff]   ;;  %v827_v16 = vld [vmem:[%s1204_s1 + $0x20] ss:$8 sps:$4 sm:$0xff]   ;;  %v809_v18 = vld [vmem:[%s1204_s1 + $0x150] ss:$8 sps:$4 sm:$0xff]  }
   0x7   :  { %585 = vmatpush1.bf16.msra.mxu0 %v797_v3  ;;  %v831_v17 = vld [vmem:[%s1204_s1 + $0x34] ss:$8 sps:$4 sm:$0xff]   ;;  %v810_v19 = vld [vmem:[%s1204_s1 + $0x164] ss:$8 sps:$4 sm:$0xff]   ;;  %v833_v20 = vld [vmem:[%s1204_s1 + $0x30] ss:$8 sps:$4 sm:$0xff]  }
   0x8   :  { %586 = vmatprep.subr.bf16.mxu0 %v798_v4  ;;  %v837_v21 = vld [vmem:[%s1204_s1 + $0x44] ss:$8 sps:$4 sm:$0xff]   ;;  %v812_v22 = vld [vmem:[%s1204_s1 + $0x160] ss:$8 sps:$4 sm:$0xff]   ;;  %v816_v23 = vld [vmem:[%s1204_s1 + $0x174] ss:$8 sps:$4 sm:$0xff]  }
   0x9   :  { %542 = vmatpush1.bf16.msra.mxu1 %v821_v12  ;;  %v839_v24 = vld [vmem:[%s1204_s1 + $0x40] ss:$8 sps:$4 sm:$0xff]   ;;  %v843_v25 = vld [vmem:[%s1204_s1 + $0x54] ss:$8 sps:$4 sm:$0xff]   ;;  %v818_v26 = vld [vmem:[%s1204_s1 + $0x170] ss:$8 sps:$4 sm:$0xff]  }
   0xa   :  { %543 = vmatprep.subr.bf16.mxu1 %v825_v14  ;;  %v822_v27 = vld [vmem:[%s1204_s1 + $0x184] ss:$8 sps:$4 sm:$0xff]   ;;  %v845_v28 = vld [vmem:[%s1204_s1 + $0x50] ss:$8 sps:$4 sm:$0xff]   ;;  %v824_v30 = vld [vmem:[%s1204_s1 + $0x180] ss:$8 sps:$4 sm:$0xff]  }
   0xb   :  { %587 = vmatpush1.bf16.msra.mxu0 %v800_v5  ;;  %v849_v29 = vld [vmem:[%s1204_s1 + $0x64] ss:$8 sps:$4 sm:$0xff]   ;;  %v828_v31 = vld [vmem:[%s1204_s1 + $0x194] ss:$8 sps:$4 sm:$0xff]   ;;  %v851_v32 = vld [vmem:[%s1204_s1 + $0x60] ss:$8 sps:$4 sm:$0xff]  }
   0xc   :  { %588 = vmatprep.subr.bf16.mxu0 %v801_v6  ;;  %v855_v33 = vld [vmem:[%s1204_s1 + $0x74] ss:$8 sps:$4 sm:$0xff]   ;;  %v830_v34 = vld [vmem:[%s1204_s1 + $0x190] ss:$8 sps:$4 sm:$0xff]   ;;  %v872_v35 = vld [vmem:[%s1205_s0 + $0xc] ss:$20 sps:$4 sm:$0xff]  }
   0xd   :  { %544 = vmatpush1.bf16.msra.mxu1 %v827_v16  ;;  %v834_v36 = vld [vmem:[%s1204_s1 + $0x1a4] ss:$8 sps:$4 sm:$0xff]   ;;  %v857_v37 = vld [vmem:[%s1204_s1 + $0x70] ss:$8 sps:$4 sm:$0xff]   ;;  %614 = vmatprep.mubr.bf16.mxu0 %v872_v35  ;;  %v836_v39 = vld [vmem:[%s1204_s1 + $0x1a0] ss:$8 sps:$4 sm:$0xff]  }
   0xe   :  { %545 = vmatprep.subr.bf16.mxu1 %v831_v17  ;;  %v861_v38 = vld [vmem:[%s1204_s1 + $0x84] ss:$8 sps:$4 sm:$0xff]   ;;  %v840_v40 = vld [vmem:[%s1204_s1 + $0x1b4] ss:$8 sps:$4 sm:$0xff]   ;;  %v863_v41 = vld [vmem:[%s1204_s1 + $0x80] ss:$8 sps:$4 sm:$0xff]  }
   0xf   :  { %589 = vmatpush1.bf16.msra.mxu0 %v803_v9  ;;  %v867_v42 = vld [vmem:[%s1204_s1 + $0x94] ss:$8 sps:$4 sm:$0xff]   ;;  %v842_v43 = vld [vmem:[%s1204_s1 + $0x1b0] ss:$8 sps:$4 sm:$0xff]   ;;  %v846_v44 = vld [vmem:[%s1204_s1 + $0x1c4] ss:$8 sps:$4 sm:$0xff]  }
  0x10   :  { %590 = vmatprep.subr.bf16.mxu0 %v804_v10  ;;  %v869_v45 = vld [vmem:[%s1204_s1 + $0x90] ss:$8 sps:$4 sm:$0xff]   ;;  %v876_v46 = vld [vmem:[%s1204_s1 + $0xa4] ss:$8 sps:$4 sm:$0xff]   ;;  %v848_v47 = vld [vmem:[%s1204_s1 + $0x1c0] ss:$8 sps:$4 sm:$0xff]  }
  0x11   :  { %546 = vmatpush1.bf16.msra.mxu1 %v833_v20  ;;  %v852_v48 = vld [vmem:[%s1204_s1 + $0x1d4] ss:$8 sps:$4 sm:$0xff]   ;;  %v878_v49 = vld [vmem:[%s1204_s1 + $0xa0] ss:$8 sps:$4 sm:$0xff]   ;;  %v854_v51 = vld [vmem:[%s1204_s1 + $0x1d0] ss:$8 sps:$4 sm:$0xff]  }
  0x12   :  { %547 = vmatprep.subr.bf16.mxu1 %v837_v21  ;;  %v882_v50 = vld [vmem:[%s1204_s1 + $0xb4] ss:$8 sps:$4 sm:$0xff]   ;;  %v858_v52 = vld [vmem:[%s1204_s1 + $0x1e4] ss:$8 sps:$4 sm:$0xff]   ;;  %v884_v53 = vld [vmem:[%s1204_s1 + $0xb0] ss:$8 sps:$4 sm:$0xff]  }
  0x13   :  { %591 = vmatpush1.bf16.msra.mxu0 %v806_v13  ;;  %v888_v54 = vld [vmem:[%s1204_s1 + $0xc4] ss:$8 sps:$4 sm:$0xff]   ;;  %v860_v56 = vld [vmem:[%s1204_s1 + $0x1e0] ss:$8 sps:$4 sm:$0xff]   ;;  %v864_v57 = vld [vmem:[%s1204_s1 + $0x1f4] ss:$8 sps:$4 sm:$0xff]  }
  0x14   :  { %592 = vmatprep.subr.bf16.mxu0 %v807_v15  ;;  %v914_v55 = vld [vmem:[%s1205_s0 + $0x4] ss:$20 sps:$4 sm:$0xff]   ;;  %v890_v58 = vld [vmem:[%s1204_s1 + $0xc0] ss:$8 sps:$4 sm:$0xff]   ;;  %v894_v59 = vld [vmem:[%s1204_s1 + $0xd4] ss:$8 sps:$4 sm:$0xff]  }
  0x15   :  { %548 = vmatpush1.bf16.msra.mxu1 %v839_v24  ;;  %571 = vmatprep.mubr.bf16.mxu1 %v914_v55  ;;  %v866_v60 = vld [vmem:[%s1204_s1 + $0x1f0] ss:$8 sps:$4 sm:$0xff]   ;;  %v875_v61 = vld [vmem:[%s1204_s1 + $0x204] ss:$8 sps:$4 sm:$0xff]   ;;  %v870_v63 = vld [vmem:[%s1205_s0 + $0x8] ss:$20 sps:$4 sm:$0xff]  }
  0x16   :  { %549 = vmatprep.subr.bf16.mxu1 %v843_v25  ;;  %v896_v62 = vld [vmem:[%s1204_s1 + $0xd0] ss:$8 sps:$4 sm:$0xff]   ;;  %v900_v0 = vld [vmem:[%s1204_s1 + $0xe4] ss:$8 sps:$4 sm:$0xff]   ;;  %v873_v1 = vld [vmem:[%s1204_s1 + $0x200] ss:$8 sps:$4 sm:$0xff]   ;;  %v103_v25 = vlaneseq }
  0x17   :  { %593 = vmatpush1.bf16.msra.mxu0 %v809_v18  ;;  %v881_v2 = vld [vmem:[%s1204_s1 + $0x214] ss:$8 sps:$4 sm:$0xff]   ;;  %v902_v3 = vld [vmem:[%s1204_s1 + $0xe0] ss:$8 sps:$4 sm:$0xff]   ;;  %v879_v5 = vld [vmem:[%s1204_s1 + $0x210] ss:$8 sps:$4 sm:$0xff]  }
  0x18   :  { %594 = vmatprep.subr.bf16.mxu0 %v810_v19  ;;  %v906_v4 = vld [vmem:[%s1204_s1 + $0xf4] ss:$8 sps:$4 sm:$0xff]   ;;  %v919_v6 = vmov 0   ;;  %v887_v7 = vld [vmem:[%s1204_s1 + $0x224] ss:$8 sps:$4 sm:$0xff]  }
  0x19   :  { %550 = vmatpush1.bf16.msra.mxu1 %v845_v28  ;;  %v908_v8 = vld [vmem:[%s1204_s1 + $0xf0] ss:$8 sps:$4 sm:$0xff]   ;;  %v885_v9 = vld [vmem:[%s1204_s1 + $0x220] ss:$8 sps:$4 sm:$0xff]   ;;  %v893_v10 = vld [vmem:[%s1204_s1 + $0x234] ss:$8 sps:$4 sm:$0xff]  }
  0x1a   :  { %551 = vmatprep.subr.bf16.mxu1 %v849_v29  ;;  %v912_v11 = vld [vmem:[%s1205_s0] ss:$20 sps:$4 sm:$0xff]   ;;  %v891_v12 = vld [vmem:[%s1204_s1 + $0x230] ss:$8 sps:$4 sm:$0xff]   ;;  %v899_v13 = vld [vmem:[%s1204_s1 + $0x244] ss:$8 sps:$4 sm:$0xff]  }
  0x1b   :  { %595 = vmatpush1.bf16.msra.mxu0 %v812_v22  ;;  %v897_v14 = vld [vmem:[%s1204_s1 + $0x240] ss:$8 sps:$4 sm:$0xff]   ;;  %v905_v15 = vld [vmem:[%s1204_s1 + $0x254] ss:$8 sps:$4 sm:$0xff]   ;;  %v903_v16 = vld [vmem:[%s1204_s1 + $0x250] ss:$8 sps:$4 sm:$0xff]  }
  0x1c   :  { %596 = vmatprep.subr.bf16.mxu0 %v816_v23  ;;  %v911_v17 = vld [vmem:[%s1204_s1 + $0x264] ss:$8 sps:$4 sm:$0xff]   ;;  %v909_v18 = vld [vmem:[%s1204_s1 + $0x260] ss:$8 sps:$4 sm:$0xff]   ;;  %v917_v19 = vld [vmem:[%s1204_s1 + $0x274] ss:$8 sps:$4 sm:$0xff]  }
  0x1d   :  { %552 = vmatpush1.bf16.msra.mxu1 %v851_v32  ;;  %v915_v20 = vld [vmem:[%s1204_s1 + $0x270] ss:$8 sps:$4 sm:$0xff]   ;;  %v101_v29 = vld [vmem:[%s1206_s2] sm:$0x3] }
  0x1e   :  { %553 = vmatprep.subr.bf16.mxu1 %v855_v33  ;;  %v918_v21 = vld [vmem:[%s1205_s0 + $0x10] ss:$20 sps:$4 sm:$0xff]  }
  0x1f   :  { %597 = vmatpush1.bf16.msra.mxu0 %v818_v26 }
  0x20   :  { %598 = vmatprep.subr.bf16.mxu0 %v822_v27  ;;  %v104_v27 = vshrl.u32 %v103_v25, 7 }
  0x21   :  { %554 = vmatpush1.bf16.msra.mxu1 %v857_v37 }
  0x22   :  { %555 = vmatprep.subr.bf16.mxu1 %v861_v38  ;;  %v105_v28 = vsub.s32 0, %v104_v27 }
  0x23   :  { %599 = vmatpush1.bf16.msra.mxu0 %v824_v30  ;;  %v109_v30 = vsub.s32 1, %v104_v27 }
  0x24   :  { %600 = vmatprep.subr.bf16.mxu0 %v828_v31  ;;  %v106_v31 = vrot.slane %v101_v29, %v105_v28 }
  0x25   :  { %556 = vmatpush1.bf16.msra.mxu1 %v863_v41  ;;  %v110_v32 = vrot.slane %v101_v29, %v109_v30 }
  0x26   :  { %557 = vmatprep.subr.bf16.mxu1 %v867_v42 }
  0x27   :  { %601 = vmatpush1.bf16.msra.mxu0 %v830_v34 }
  0x28   :  { %602 = vmatprep.subr.bf16.mxu0 %v834_v36 }
  0x29   :  { %558 = vmatpush1.bf16.msra.mxu1 %v869_v45 }
  0x2a   :  { %559 = vmatprep.subr.bf16.mxu1 %v876_v46 }
  0x2b   :  { %603 = vmatpush1.bf16.msra.mxu0 %v836_v39 }
  0x2c   :  { %604 = vmatprep.subr.bf16.mxu0 %v840_v40 }
  0x2d   :  { %560 = vmatpush1.bf16.msra.mxu1 %v878_v49 }
  0x2e   :  { %561 = vmatprep.subr.bf16.mxu1 %v882_v50 }
  0x2f   :  { %605 = vmatpush1.bf16.msra.mxu0 %v842_v43 }
  0x30   :  { %606 = vmatprep.subr.bf16.mxu0 %v846_v44 }
  0x31   :  { %562 = vmatpush1.bf16.msra.mxu1 %v884_v53 }
  0x32   :  { %563 = vmatprep.subr.bf16.mxu1 %v888_v54 }
  0x33   :  { %607 = vmatpush1.bf16.msra.mxu0 %v848_v47 }
  0x34   :  { %608 = vmatprep.subr.bf16.mxu0 %v852_v48 }
  0x35   :  { %564 = vmatpush1.bf16.msra.mxu1 %v890_v58 }
  0x36   :  { %565 = vmatprep.subr.bf16.mxu1 %v894_v59 }
  0x37   :  { %609 = vmatpush1.bf16.msra.mxu0 %v854_v51 }
  0x38   :  { %610 = vmatprep.subr.bf16.mxu0 %v858_v52 }
  0x39   :  { %566 = vmatpush1.bf16.msra.mxu1 %v896_v62 }
  0x3a   :  { %567 = vmatprep.subr.bf16.mxu1 %v900_v0 }
  0x3b   :  { %611 = vmatpush1.bf16.msra.mxu0 %v860_v56 }
  0x3c   :  { %612 = vmatprep.subr.bf16.mxu0 %v864_v57 }
  0x3d   :  { %568 = vmatpush1.bf16.msra.mxu1 %v902_v3 }
  0x3e   :  { %569 = vmatprep.subr.bf16.mxu1 %v906_v4 }
  0x3f   :  { %613 = vmatpush1.bf16.msra.mxu0 %v866_v60 }
  0x40   :  { %625 = vmatprep.subr.bf16.mxu0 %v875_v61 }
  0x41   :  { %570 = vmatpush1.bf16.msra.mxu1 %v908_v8 }
  0x42   :  { %615 = vmatmul.mubr.bf16.vlgmr.msra.gmra.mrb[0].mxu0 %v870_v63 }
  0x43   :  { %626 = vmatpush1.bf16.msra.mxu0 %v873_v1  ;;  %657 = vmatprep.mubr.bf16.mxu0 %v919_v6 }
  0x44   :  { %627 = vmatprep.subr.bf16.mxu0 %v881_v2  ;;  %572 = vmatmul.mubr.bf16.vlgmr.msra.gmra.mrb[0].mxu1 %v912_v11 }
  0x47   :  { %628 = vmatpush1.bf16.msra.mxu0 %v879_v5 }
  0x48   :  { %629 = vmatprep.subr.bf16.mxu0 %v887_v7 }
  0x4b   :  { %630 = vmatpush1.bf16.msra.mxu0 %v885_v9 }
  0x4c   :  { %631 = vmatprep.subr.bf16.mxu0 %v893_v10 }
  0x4f   :  { %632 = vmatpush1.bf16.msra.mxu0 %v891_v12 }
  0x50   :  { %633 = vmatprep.subr.bf16.mxu0 %v899_v13 }
  0x53   :  { %634 = vmatpush1.bf16.msra.mxu0 %v897_v14 }
  0x54   :  { %635 = vmatprep.subr.bf16.mxu0 %v905_v15 }
  0x57   :  { %636 = vmatpush1.bf16.msra.mxu0 %v903_v16 }
  0x58   :  { %637 = vmatprep.subr.bf16.mxu0 %v911_v17 }
  0x5b   :  { %638 = vmatpush1.bf16.msra.mxu0 %v909_v18 }
  0x5c   :  { %639 = vmatprep.subr.bf16.mxu0 %v917_v19 }
  0x5f   :  { %640 = vmatpush1.bf16.msra.mxu0 %v915_v20 }
  0x62   :  { %658 = vmatmul.mubr.bf16.vlgmr.msra.gmra.mrb[0].mxu0 %v918_v21 }
 0x117   :  { %v573_v22 = vpop.f32.mrb[0].mxu1 }
 0x118   :  { %v575_v23 = vpop.f32.mrb[1].mxu1  ;;  %v574_v33 = vadd.f32 %v573_v22, %v106_v31 }
 0x119   :  { %v577_v24 = vpop.f32.mrb[2].mxu1  ;;  %v576_v34 = vadd.f32 %v575_v23, %v110_v32 }
 0x11a   :  { %v579_v26 = vpop.f32.mrb[3].mxu1  ;;  %v578_v36 = vadd.f32 %v577_v24, %v106_v31 }
 0x11b   :  { %v580_v39 = vadd.f32 %v579_v26, %v110_v32 }
 0x135   :  { %v659_v35 = vpop.f32.mrb[0].mxu0 }
 0x136   :  { %v780_v37 = vadd.f32 %v659_v35, %v574_v33  ;;  %v661_v38 = vpop.f32.mrb[1].mxu0 }
 0x137   :  { %v782_v40 = vadd.f32 %v661_v38, %v576_v34  ;;  %v663_v41 = vpop.f32.mrb[2].mxu0 }
 0x138   :  { %v668_v42 = vmax.f32 %v780_v37, 0.0  ;;  %v784_v43 = vadd.f32 %v663_v41, %v578_v36  ;;  %v665_v44 = vpop.f32.mrb[3].mxu0 }
 0x139   :  { %v669_v45 = vmax.f32 %v782_v40, 0.0  ;;  %v786_v46 = vadd.f32 %v665_v44, %v580_v39 }
 0x13a   :  { %v670_v47 = vmax.f32 %v784_v43, 0.0 }
 0x13b   :  { %v777_v48 = vpack.c.bf16 %v669_v45, %v668_v42  ;;  %v671_v49 = vmax.f32 %v786_v46, 0.0 }
 0x13d   :  { %684 = vst [vmem:[%s1207_s3] sm:$0xff] %v777_v48  ;;  %v778_v50 = vpack.c.bf16 %v671_v49, %v670_v47 }
 0x13f   :  { %685 = vst [vmem:[%s1207_s3 + $0x8] sm:$0xff] %v778_v50 }

// kernel: density_map_forward.5
= control target key start
LH: loop header
LB: loop body
LE: loop exit
PB: predicated region body
PF: predicated region fallthrough
CT: control target
= control target key end

     0   :  { %s5116_s1 = inlined_call_operand.vmem [shape: bf16[1792,384], index: 1, kind: input, shape index: {}]   ;;  %s5117_s0 = inlined_call_operand.vmem [shape: bf16[16,1792], index: 0, kind: input, shape index: {}]   ;;  %s5118_s2 = inlined_call_operand.vmem [shape: f32[1,384], index: 2, kind: input, shape index: {}]   ;;  %s5119_s3 = inlined_call_operand.vmem [shape: f32[16,384], index: 3, kind: output, shape index: {}]  }
   0x1   :  { %v3492_v0 = vld [vmem:[%s5116_s1 + $0x4] ss:$12 sps:$4 sm:$0xff]   ;;  %v3496_v2 = vld [vmem:[%s5116_s1] ss:$12 sps:$4 sm:$0xff]   ;;  %v3498_v4 = vld [vmem:[%s5116_s1 + $0x1c] ss:$12 sps:$4 sm:$0xff]  }
   0x2   :  { %v3494_v1 = vld [vmem:[%s5116_s1 + $0x304] ss:$12 sps:$4 sm:$0xff]   ;;  %2356 = vmatprep.subr.bf16.mxu1 %v3492_v0  ;;  %v3497_v3 = vld [vmem:[%s5116_s1 + $0x300] ss:$12 sps:$4 sm:$0xff]   ;;  %v3500_v5 = vld [vmem:[%s5116_s1 + $0x31c] ss:$12 sps:$4 sm:$0xff]  }
   0x3   :  { %2442 = vmatprep.subr.bf16.mxu0 %v3494_v1  ;;  %2357 = vmatpush1.bf16.msra.mxu1 %v3496_v2  ;;  %v3502_v6 = vld [vmem:[%s5116_s1 + $0x18] ss:$12 sps:$4 sm:$0xff]   ;;  %v3504_v8 = vld [vmem:[%s5116_s1 + $0x34] ss:$12 sps:$4 sm:$0xff]   ;;  %v3508_v10 = vld [vmem:[%s5116_s1 + $0x30] ss:$12 sps:$4 sm:$0xff]  }
   0x4   :  { %2443 = vmatpush1.bf16.msra.mxu0 %v3497_v3  ;;  %2358 = vmatprep.subr.bf16.mxu1 %v3498_v4  ;;  %v3503_v7 = vld [vmem:[%s5116_s1 + $0x318] ss:$12 sps:$4 sm:$0xff]   ;;  %v3506_v9 = vld [vmem:[%s5116_s1 + $0x334] ss:$12 sps:$4 sm:$0xff]   ;;  %v3509_v11 = vld [vmem:[%s5116_s1 + $0x330] ss:$12 sps:$4 sm:$0xff]  }
   0x5   :  { %2444 = vmatprep.subr.bf16.mxu0 %v3500_v5  ;;  %v3510_v12 = vld [vmem:[%s5116_s1 + $0x4c] ss:$12 sps:$4 sm:$0xff]   ;;  %v3514_v14 = vld [vmem:[%s5116_s1 + $0x48] ss:$12 sps:$4 sm:$0xff]   ;;  %v3516_v16 = vld [vmem:[%s5116_s1 + $0x64] ss:$12 sps:$4 sm:$0xff]  }
   0x6   :  { %v3512_v13 = vld [vmem:[%s5116_s1 + $0x34c] ss:$12 sps:$4 sm:$0xff]   ;;  %v3515_v15 = vld [vmem:[%s5116_s1 + $0x348] ss:$12 sps:$4 sm:$0xff]   ;;  %v3518_v17 = vld [vmem:[%s5116_s1 + $0x364] ss:$12 sps:$4 sm:$0xff]  }
   0x7   :  { %2359 = vmatpush1.bf16.msra.mxu1 %v3502_v6  ;;  %v3520_v18 = vld [vmem:[%s5116_s1 + $0x60] ss:$12 sps:$4 sm:$0xff]   ;;  %v3522_v20 = vld [vmem:[%s5116_s1 + $0x7c] ss:$12 sps:$4 sm:$0xff]   ;;  %v3526_v22 = vld [vmem:[%s5116_s1 + $0x78] ss:$12 sps:$4 sm:$0xff]  }
   0x8   :  { %2445 = vmatpush1.bf16.msra.mxu0 %v3503_v7  ;;  %2360 = vmatprep.subr.bf16.mxu1 %v3504_v8  ;;  %v3521_v19 = vld [vmem:[%s5116_s1 + $0x360] ss:$12 sps:$4 sm:$0xff]   ;;  %v3524_v21 = vld [vmem:[%s5116_s1 + $0x37c] ss:$12 sps:$4 sm:$0xff]   ;;  %v3527_v23 = vld [vmem:[%s5116_s1 + $0x378] ss:$12 sps:$4 sm:$0xff]  }
   0x9   :  { %2446 = vmatprep.subr.bf16.mxu0 %v3506_v9  ;;  %v3528_v24 = vld [vmem:[%s5116_s1 + $0x94] ss:$12 sps:$4 sm:$0xff]   ;;  %v3532_v26 = vld [vmem:[%s5116_s1 + $0x90] ss:$12 sps:$4 sm:$0xff]   ;;  %v3534_v28 = vld [vmem:[%s5116_s1 + $0xac] ss:$12 sps:$4 sm:$0xff]  }
   0xa   :  { %v3530_v25 = vld [vmem:[%s5116_s1 + $0x394] ss:$12 sps:$4 sm:$0xff]   ;;  %v3533_v27 = vld [vmem:[%s5116_s1 + $0x390] ss:$12 sps:$4 sm:$0xff]   ;;  %v3536_v29 = vld [vmem:[%s5116_s1 + $0x3ac] ss:$12 sps:$4 sm:$0xff]  }
   0xb   :  { %2361 = vmatpush1.bf16.msra.mxu1 %v3508_v10  ;;  %v3538_v30 = vld [vmem:[%s5116_s1 + $0xa8] ss:$12 sps:$4 sm:$0xff]   ;;  %v3540_v32 = vld [vmem:[%s5116_s1 + $0xc4] ss:$12 sps:$4 sm:$0xff]   ;;  %v3544_v34 = vld [vmem:[%s5116_s1 + $0xc0] ss:$12 sps:$4 sm:$0xff]  }
   0xc   :  { %2447 = vmatpush1.bf16.msra.mxu0 %v3509_v11  ;;  %2362 = vmatprep.subr.bf16.mxu1 %v3510_v12  ;;  %v3539_v31 = vld [vmem:[%s5116_s1 + $0x3a8] ss:$12 sps:$4 sm:$0xff]   ;;  %v3542_v33 = vld [vmem:[%s5116_s1 + $0x3c4] ss:$12 sps:$4 sm:$0xff]   ;;  %v3545_v35 = vld [vmem:[%s5116_s1 + $0x3c0] ss:$12 sps:$4 sm:$0xff]  }
   0xd   :  { %2448 = vmatprep.subr.bf16.mxu0 %v3512_v13  ;;  %v3546_v36 = vld [vmem:[%s5116_s1 + $0xdc] ss:$12 sps:$4 sm:$0xff]   ;;  %v3550_v38 = vld [vmem:[%s5116_s1 + $0xd8] ss:$12 sps:$4 sm:$0xff]   ;;  %v3552_v40 = vld [vmem:[%s5116_s1 + $0xf4] ss:$12 sps:$4 sm:$0xff]  }
   0xe   :  { %v3548_v37 = vld [vmem:[%s5116_s1 + $0x3dc] ss:$12 sps:$4 sm:$0xff]   ;;  %v3551_v39 = vld [vmem:[%s5116_s1 + $0x3d8] ss:$12 sps:$4 sm:$0xff]   ;;  %v3554_v41 = vld [vmem:[%s5116_s1 + $0x3f4] ss:$12 sps:$4 sm:$0xff]  }
   0xf   :  { %2363 = vmatpush1.bf16.msra.mxu1 %v3514_v14  ;;  %v3556_v42 = vld [vmem:[%s5116_s1 + $0xf0] ss:$12 sps:$4 sm:$0xff]   ;;  %v3558_v44 = vld [vmem:[%s5116_s1 + $0x10c] ss:$12 sps:$4 sm:$0xff]   ;;  %v3562_v46 = vld [vmem:[%s5116_s1 + $0x108] ss:$12 sps:$4 sm:$0xff]  }
  0x10   :  { %2449 = vmatpush1.bf16.msra.mxu0 %v3515_v15  ;;  %2364 = vmatprep.subr.bf16.mxu1 %v3516_v16  ;;  %v3557_v43 = vld [vmem:[%s5116_s1 + $0x3f0] ss:$12 sps:$4 sm:$0xff]   ;;  %v3560_v45 = vld [vmem:[%s5116_s1 + $0x40c] ss:$12 sps:$4 sm:$0xff]   ;;  %v3563_v47 = vld [vmem:[%s5116_s1 + $0x408] ss:$12 sps:$4 sm:$0xff]  }
  0x11   :  { %2450 = vmatprep.subr.bf16.mxu0 %v3518_v17  ;;  %v4132_v48 = vld [vmem:[%s5117_s0 + $0x4] ss:$56 sps:$4 sm:$0xff]   ;;  %v3596_v51 = vld [vmem:[%s5117_s0 + $0x14] ss:$56 sps:$4 sm:$0xff]   ;;  %v4195_v4 = vld [vmem:[%s5117_s0] ss:$56 sps:$4 sm:$0xff]  }
  0x12   :  { %v3564_v49 = vld [vmem:[%s5116_s1 + $0x124] ss:$12 sps:$4 sm:$0xff]   ;;  %2388 = vmatprep.mubr.bf16.mxu1 %v4132_v48  ;;  %v3568_v52 = vld [vmem:[%s5116_s1 + $0x120] ss:$12 sps:$4 sm:$0xff]   ;;  %v3570_v54 = vld [vmem:[%s5116_s1 + $0x13c] ss:$12 sps:$4 sm:$0xff]   ;;  %2474 = vmatprep.mubr.bf16.mxu0 %v3596_v51 }
  0x13   :  { %2365 = vmatpush1.bf16.msra.mxu1 %v3520_v18  ;;  %v3566_v50 = vld [vmem:[%s5116_s1 + $0x424] ss:$12 sps:$4 sm:$0xff]   ;;  %v3569_v53 = vld [vmem:[%s5116_s1 + $0x420] ss:$12 sps:$4 sm:$0xff]   ;;  %v3572_v55 = vld [vmem:[%s5116_s1 + $0x43c] ss:$12 sps:$4 sm:$0xff]  }
  0x14   :  { %2451 = vmatpush1.bf16.msra.mxu0 %v3521_v19  ;;  %2366 = vmatprep.subr.bf16.mxu1 %v3522_v20  ;;  %v3574_v56 = vld [vmem:[%s5116_s1 + $0x138] ss:$12 sps:$4 sm:$0xff]   ;;  %v3576_v58 = vld [vmem:[%s5116_s1 + $0x154] ss:$12 sps:$4 sm:$0xff]   ;;  %v3580_v60 = vld [vmem:[%s5116_s1 + $0x150] ss:$12 sps:$4 sm:$0xff]  }
  0x15   :  { %2452 = vmatprep.subr.bf16.mxu0 %v3524_v21  ;;  %v3575_v57 = vld [vmem:[%s5116_s1 + $0x438] ss:$12 sps:$4 sm:$0xff]   ;;  %v3578_v59 = vld [vmem:[%s5116_s1 + $0x454] ss:$12 sps:$4 sm:$0xff]   ;;  %v3581_v61 = vld [vmem:[%s5116_s1 + $0x450] ss:$12 sps:$4 sm:$0xff]  }
  0x16   :  { %v3582_v62 = vld [vmem:[%s5116_s1 + $0x16c] ss:$12 sps:$4 sm:$0xff]   ;;  %v3586_v0 = vld [vmem:[%s5116_s1 + $0x168] ss:$12 sps:$4 sm:$0xff]   ;;  %v3593_v2 = vld [vmem:[%s5116_s1 + $0x184] ss:$12 sps:$4 sm:$0xff]  }
  0x17   :  { %2367 = vmatpush1.bf16.msra.mxu1 %v3526_v22  ;;  %v3584_v63 = vld [vmem:[%s5116_s1 + $0x46c] ss:$12 sps:$4 sm:$0xff]   ;;  %v3587_v1 = vld [vmem:[%s5116_s1 + $0x468] ss:$12 sps:$4 sm:$0xff]   ;;  %v3599_v3 = vld [vmem:[%s5116_s1 + $0x484] ss:$12 sps:$4 sm:$0xff]  }
  0x18   :  { %2453 = vmatpush1.bf16.msra.mxu0 %v3527_v23  ;;  %2368 = vmatprep.subr.bf16.mxu1 %v3528_v24  ;;  %v3591_v5 = vld [vmem:[%s5116_s1 + $0x180] ss:$12 sps:$4 sm:$0xff]   ;;  %v3594_v6 = vld [vmem:[%s5117_s0 + $0x10] ss:$56 sps:$4 sm:$0xff]   ;;  %v3600_v10 = vld [vmem:[%s5116_s1 + $0x198] ss:$12 sps:$4 sm:$0xff]  }
  0x19   :  { %2454 = vmatprep.subr.bf16.mxu0 %v3530_v25  ;;  %v3597_v7 = vld [vmem:[%s5116_s1 + $0x480] ss:$12 sps:$4 sm:$0xff]   ;;  %v3602_v8 = vld [vmem:[%s5116_s1 + $0x19c] ss:$12 sps:$4 sm:$0xff]   ;;  %v3603_v11 = vld [vmem:[%s5116_s1 + $0x498] ss:$12 sps:$4 sm:$0xff]  }
  0x1a   :  { %v3605_v9 = vld [vmem:[%s5116_s1 + $0x49c] ss:$12 sps:$4 sm:$0xff]   ;;  %v3608_v12 = vld [vmem:[%s5116_s1 + $0x1b4] ss:$12 sps:$4 sm:$0xff]   ;;  %v3614_v16 = vld [vmem:[%s5116_s1 + $0x1cc] ss:$12 sps:$4 sm:$0xff]  }
  0x1b   :  { %2369 = vmatpush1.bf16.msra.mxu1 %v3532_v26  ;;  %v3611_v13 = vld [vmem:[%s5116_s1 + $0x4b4] ss:$12 sps:$4 sm:$0xff]   ;;  %v3606_v14 = vld [vmem:[%s5116_s1 + $0x1b0] ss:$12 sps:$4 sm:$0xff]   ;;  %v3617_v17 = vld [vmem:[%s5116_s1 + $0x4cc] ss:$12 sps:$4 sm:$0xff]  }
  0x1c   :  { %2455 = vmatpush1.bf16.msra.mxu0 %v3533_v27  ;;  %2370 = vmatprep.subr.bf16.mxu1 %v3534_v28  ;;  %v3609_v15 = vld [vmem:[%s5116_s1 + $0x4b0] ss:$12 sps:$4 sm:$0xff]   ;;  %v3612_v18 = vld [vmem:[%s5116_s1 + $0x1c8] ss:$12 sps:$4 sm:$0xff]   ;;  %v3618_v22 = vld [vmem:[%s5116_s1 + $0x1e0] ss:$12 sps:$4 sm:$0xff]  }
  0x1d   :  { %2456 = vmatprep.subr.bf16.mxu0 %v3536_v29  ;;  %v3615_v19 = vld [vmem:[%s5116_s1 + $0x4c8] ss:$12 sps:$4 sm:$0xff]   ;;  %v3620_v20 = vld [vmem:[%s5116_s1 + $0x1e4] ss:$12 sps:$4 sm:$0xff]   ;;  %v3621_v23 = vld [vmem:[%s5116_s1 + $0x4e0] ss:$12 sps:$4 sm:$0xff]  }
  0x1e   :  { %v3623_v21 = vld [vmem:[%s5116_s1 + $0x4e4] ss:$12 sps:$4 sm:$0xff]   ;;  %v3626_v24 = vld [vmem:[%s5116_s1 + $0x1fc] ss:$12 sps:$4 sm:$0xff]   ;;  %v3632_v28 = vld [vmem:[%s5116_s1 + $0x214] ss:$12 sps:$4 sm:$0xff]  }
  0x1f   :  { %2371 = vmatpush1.bf16.msra.mxu1 %v3538_v30  ;;  %v3629_v25 = vld [vmem:[%s5116_s1 + $0x4fc] ss:$12 sps:$4 sm:$0xff]   ;;  %v3624_v26 = vld [vmem:[%s5116_s1 + $0x1f8] ss:$12 sps:$4 sm:$0xff]   ;;  %v3635_v29 = vld [vmem:[%s5116_s1 + $0x514] ss:$12 sps:$4 sm:$0xff]  }
  0x20   :  { %2457 = vmatpush1.bf16.msra.mxu0 %v3539_v31  ;;  %2372 = vmatprep.subr.bf16.mxu1 %v3540_v32  ;;  %v3627_v27 = vld [vmem:[%s5116_s1 + $0x4f8] ss:$12 sps:$4 sm:$0xff]   ;;  %v3630_v30 = vld [vmem:[%s5116_s1 + $0x210] ss:$12 sps:$4 sm:$0xff]  }
  0x21   :  { %2458 = vmatprep.subr.bf16.mxu0 %v3542_v33  ;;  %v3633_v31 = vld [vmem:[%s5116_s1 + $0x510] ss:$12 sps:$4 sm:$0xff]   ;;  %v3638_v32 = vld [vmem:[%s5116_s1 + $0x22c] ss:$12 sps:$4 sm:$0xff]  }
  0x22   :  { %v3641_v33 = vld [vmem:[%s5116_s1 + $0x52c] ss:$12 sps:$4 sm:$0xff]  }
  0x23   :  { %2373 = vmatpush1.bf16.msra.mxu1 %v3544_v34  ;;  %v4288_v34 = vld [vmem:[%s5117_s0 + $0xc] ss:$56 sps:$4 sm:$0xff]  }
  0x24   :  { %2459 = vmatpush1.bf16.msra.mxu0 %v3545_v35  ;;  %2374 = vmatprep.subr.bf16.mxu1 %v3546_v36  ;;  %v3695_v35 = vld [vmem:[%s5117_s0 + $0x1c] ss:$56 sps:$4 sm:$0xff]   ;;  %v3662_v51 = vld [vmem:[%s5116_s1 + $0x28c] ss:$12 sps:$4 sm:$0xff]  }
  0x25   :  { %2460 = vmatprep.subr.bf16.mxu0 %v3548_v37  ;;  %v3636_v36 = vld [vmem:[%s5116_s1 + $0x228] ss:$12 sps:$4 sm:$0xff]  }
  0x26   :  { %v3639_v37 = vld [vmem:[%s5116_s1 + $0x528] ss:$12 sps:$4 sm:$0xff]  }
  0x27   :  { %2375 = vmatpush1.bf16.msra.mxu1 %v3550_v38  ;;  %v3644_v38 = vld [vmem:[%s5116_s1 + $0x244] ss:$12 sps:$4 sm:$0xff]  }
  0x28   :  { %2461 = vmatpush1.bf16.msra.mxu0 %v3551_v39  ;;  %2376 = vmatprep.subr.bf16.mxu1 %v3552_v40  ;;  %v3647_v39 = vld [vmem:[%s5116_s1 + $0x544] ss:$12 sps:$4 sm:$0xff]   ;;  %v3642_v40 = vld [vmem:[%s5116_s1 + $0x240] ss:$12 sps:$4 sm:$0xff]  }
  0x29   :  { %2462 = vmatprep.subr.bf16.mxu0 %v3554_v41  ;;  %v3645_v41 = vld [vmem:[%s5116_s1 + $0x540] ss:$12 sps:$4 sm:$0xff]  }
  0x2b   :  { %2377 = vmatpush1.bf16.msra.mxu1 %v3556_v42  ;;  %v3650_v42 = vld [vmem:[%s5116_s1 + $0x25c] ss:$12 sps:$4 sm:$0xff]  }
  0x2c   :  { %2463 = vmatpush1.bf16.msra.mxu0 %v3557_v43  ;;  %2378 = vmatprep.subr.bf16.mxu1 %v3558_v44  ;;  %v3653_v43 = vld [vmem:[%s5116_s1 + $0x55c] ss:$12 sps:$4 sm:$0xff]   ;;  %v3648_v44 = vld [vmem:[%s5116_s1 + $0x258] ss:$12 sps:$4 sm:$0xff]  }
  0x2d   :  { %2464 = vmatprep.subr.bf16.mxu0 %v3560_v45  ;;  %v3651_v45 = vld [vmem:[%s5116_s1 + $0x558] ss:$12 sps:$4 sm:$0xff]  }
  0x2f   :  { %2379 = vmatpush1.bf16.msra.mxu1 %v3562_v46  ;;  %v3656_v46 = vld [vmem:[%s5116_s1 + $0x274] ss:$12 sps:$4 sm:$0xff]  }
  0x30   :  { %2465 = vmatpush1.bf16.msra.mxu0 %v3563_v47  ;;  %2380 = vmatprep.subr.bf16.mxu1 %v3564_v49  ;;  %v3659_v47 = vld [vmem:[%s5116_s1 + $0x574] ss:$12 sps:$4 sm:$0xff]   ;;  %v3654_v49 = vld [vmem:[%s5116_s1 + $0x270] ss:$12 sps:$4 sm:$0xff]  }
  0x31   :  { %2466 = vmatprep.subr.bf16.mxu0 %v3566_v50  ;;  %v3657_v50 = vld [vmem:[%s5116_s1 + $0x570] ss:$12 sps:$4 sm:$0xff]  }
  0x33   :  { %2381 = vmatpush1.bf16.msra.mxu1 %v3568_v52  ;;  %v3665_v52 = vld [vmem:[%s5116_s1 + $0x58c] ss:$12 sps:$4 sm:$0xff]  }
  0x34   :  { %2467 = vmatpush1.bf16.msra.mxu0 %v3569_v53  ;;  %2382 = vmatprep.subr.bf16.mxu1 %v3570_v54  ;;  %v3660_v53 = vld [vmem:[%s5116_s1 + $0x288] ss:$12 sps:$4 sm:$0xff]  }
  0x35   :  { %2468 = vmatprep.subr.bf16.mxu0 %v3572_v55  ;;  %v3663_v54 = vld [vmem:[%s5116_s1 + $0x588] ss:$12 sps:$4 sm:$0xff]   ;;  %v3668_v55 = vld [vmem:[%s5116_s1 + $0x2a4] ss:$12 sps:$4 sm:$0xff]  }
  0x37   :  { %2383 = vmatpush1.bf16.msra.mxu1 %v3574_v56  ;;  %v3671_v56 = vld [vmem:[%s5116_s1 + $0x5a4] ss:$12 sps:$4 sm:$0xff]  }
  0x38   :  { %2469 = vmatpush1.bf16.msra.mxu0 %v3575_v57  ;;  %2384 = vmatprep.subr.bf16.mxu1 %v3576_v58  ;;  %v3666_v57 = vld [vmem:[%s5116_s1 + $0x2a0] ss:$12 sps:$4 sm:$0xff]  }
  0x39   :  { %2470 = vmatprep.subr.bf16.mxu0 %v3578_v59  ;;  %v3669_v58 = vld [vmem:[%s5116_s1 + $0x5a0] ss:$12 sps:$4 sm:$0xff]   ;;  %v3674_v59 = vld [vmem:[%s5116_s1 + $0x2bc] ss:$12 sps:$4 sm:$0xff]  }
  0x3b   :  { %2385 = vmatpush1.bf16.msra.mxu1 %v3580_v60  ;;  %v3677_v60 = vld [vmem:[%s5116_s1 + $0x5bc] ss:$12 sps:$4 sm:$0xff]  }
  0x3c   :  { %2471 = vmatpush1.bf16.msra.mxu0 %v3581_v61  ;;  %2386 = vmatprep.subr.bf16.mxu1 %v3582_v62  ;;  %v3672_v61 = vld [vmem:[%s5116_s1 + $0x2b8] ss:$12 sps:$4 sm:$0xff]  }
  0x3d   :  { %2472 = vmatprep.subr.bf16.mxu0 %v3584_v63  ;;  %v3675_v62 = vld [vmem:[%s5116_s1 + $0x5b8] ss:$12 sps:$4 sm:$0xff]   ;;  %v3680_v63 = vld [vmem:[%s5116_s1 + $0x2d4] ss:$12 sps:$4 sm:$0xff]  }
  0x3f   :  { %2387 = vmatpush1.bf16.msra.mxu1 %v3586_v0  ;;  %v3683_v0 = vld [vmem:[%s5116_s1 + $0x5d4] ss:$12 sps:$4 sm:$0xff]  }
  0x40   :  { %2473 = vmatpush1.bf16.msra.mxu0 %v3587_v1  ;;  %2399 = vmatprep.subr.bf16.mxu1 %v3593_v2  ;;  %v3678_v1 = vld [vmem:[%s5116_s1 + $0x2d0] ss:$12 sps:$4 sm:$0xff]  }
  0x41   :  { %2485 = vmatprep.subr.bf16.mxu0 %v3599_v3  ;;  %v3681_v2 = vld [vmem:[%s5116_s1 + $0x5d0] ss:$12 sps:$4 sm:$0xff]   ;;  %v3686_v3 = vld [vmem:[%s5116_s1 + $0x2ec] ss:$12 sps:$4 sm:$0xff]  }
  0x42   :  { %2389 = vmatmul.mubr.bf16.vlgmr.msra.gmra.mrb[0].mxu1 %v4195_v4 }
  0x43   :  { %2475 = vmatmul.mubr.bf16.vlgmr.msra.gmra.mrb[0].mxu0 %v3594_v6  ;;  %2400 = vmatpush1.bf16.msra.mxu1 %v3591_v5  ;;  %v3689_v5 = vld [vmem:[%s5116_s1 + $0x5ec] ss:$12 sps:$4 sm:$0xff]   ;;  %v3684_v6 = vld [vmem:[%s5116_s1 + $0x2e8] ss:$12 sps:$4 sm:$0xff]  }
  0x44   :  { %2486 = vmatpush1.bf16.msra.mxu0 %v3597_v7  ;;  %2401 = vmatprep.subr.bf16.mxu1 %v3602_v8  ;;  %v3687_v7 = vld [vmem:[%s5116_s1 + $0x5e8] ss:$12 sps:$4 sm:$0xff]   ;;  %v3698_v8 = vld [vmem:[%s5116_s1 + $0x604] ss:$12 sps:$4 sm:$0xff]  }
  0x45   :  { %2487 = vmatprep.subr.bf16.mxu0 %v3605_v9  ;;  %2431 = vmatprep.mubr.bf16.mxu1 %v4288_v34  ;;  %v4402_v9 = vld [vmem:[%s5117_s0 + $0x8] ss:$56 sps:$4 sm:$0xff]  }
  0x46   :  { %2517 = vmatprep.mubr.bf16.mxu0 %v3695_v35  ;;  %v3728_v35 = vld [vmem:[%s5116_s1 + $0x694] ss:$12 sps:$4 sm:$0xff]  }
  0x47   :  { %2402 = vmatpush1.bf16.msra.mxu1 %v3600_v10  ;;  %v3699_v10 = vld [vmem:[%s5116_s1 + $0xc8] ss:$12 sps:$4 sm:$0xff]  }
  0x48   :  { %2488 = vmatpush1.bf16.msra.mxu0 %v3603_v11  ;;  %2403 = vmatprep.subr.bf16.mxu1 %v3608_v12  ;;  %v3693_v11 = vld [vmem:[%s5117_s0 + $0x18] ss:$56 sps:$4 sm:$0xff]   ;;  %v3696_v12 = vld [vmem:[%s5116_s1 + $0x600] ss:$12 sps:$4 sm:$0xff]  }
  0x49   :  { %2489 = vmatprep.subr.bf16.mxu0 %v3611_v13  ;;  %v3700_v13 = vld [vmem:[%s5116_s1 + $0x8] ss:$12 sps:$4 sm:$0xff]  }
  0x4b   :  { %2404 = vmatpush1.bf16.msra.mxu1 %v3606_v14  ;;  %v3703_v14 = vld [vmem:[%s5116_s1 + $0x61c] ss:$12 sps:$4 sm:$0xff]  }
  0x4c   :  { %2490 = vmatpush1.bf16.msra.mxu0 %v3609_v15  ;;  %2405 = vmatprep.subr.bf16.mxu1 %v3614_v16  ;;  %v3704_v15 = vld [vmem:[%s5116_s1 + $0xe0] ss:$12 sps:$4 sm:$0xff]   ;;  %v3701_v16 = vld [vmem:[%s5116_s1 + $0x618] ss:$12 sps:$4 sm:$0xff]  }
  0x4d   :  { %2491 = vmatprep.subr.bf16.mxu0 %v3617_v17  ;;  %v3705_v17 = vld [vmem:[%s5116_s1 + $0x20] ss:$12 sps:$4 sm:$0xff]  }
  0x4f   :  { %2406 = vmatpush1.bf16.msra.mxu1 %v3612_v18  ;;  %v3708_v18 = vld [vmem:[%s5116_s1 + $0x634] ss:$12 sps:$4 sm:$0xff]  }
  0x50   :  { %2492 = vmatpush1.bf16.msra.mxu0 %v3615_v19  ;;  %2407 = vmatprep.subr.bf16.mxu1 %v3620_v20  ;;  %v3709_v19 = vld [vmem:[%s5116_s1 + $0xf8] ss:$12 sps:$4 sm:$0xff]   ;;  %v3706_v20 = vld [vmem:[%s5116_s1 + $0x630] ss:$12 sps:$4 sm:$0xff]  }
  0x51   :  { %2493 = vmatprep.subr.bf16.mxu0 %v3623_v21  ;;  %v3710_v21 = vld [vmem:[%s5116_s1 + $0x38] ss:$12 sps:$4 sm:$0xff]  }
  0x53   :  { %2408 = vmatpush1.bf16.msra.mxu1 %v3618_v22  ;;  %v3713_v22 = vld [vmem:[%s5116_s1 + $0x64c] ss:$12 sps:$4 sm:$0xff]  }
  0x54   :  { %2494 = vmatpush1.bf16.msra.mxu0 %v3621_v23  ;;  %2409 = vmatprep.subr.bf16.mxu1 %v3626_v24  ;;  %v3714_v23 = vld [vmem:[%s5116_s1 + $0x110] ss:$12 sps:$4 sm:$0xff]  }
  0x55   :  { %2495 = vmatprep.subr.bf16.mxu0 %v3629_v25  ;;  %v3715_v24 = vld [vmem:[%s5116_s1 + $0x50] ss:$12 sps:$4 sm:$0xff]  }
  0x56   :  { %v3718_v25 = vld [vmem:[%s5116_s1 + $0x664] ss:$12 sps:$4 sm:$0xff]  }
  0x57   :  { %2410 = vmatpush1.bf16.msra.mxu1 %v3624_v26  ;;  %v3719_v26 = vld [vmem:[%s5116_s1 + $0x128] ss:$12 sps:$4 sm:$0xff]  }
  0x58   :  { %2496 = vmatpush1.bf16.msra.mxu0 %v3627_v27  ;;  %2411 = vmatprep.subr.bf16.mxu1 %v3632_v28  ;;  %v3716_v27 = vld [vmem:[%s5116_s1 + $0x660] ss:$12 sps:$4 sm:$0xff]   ;;  %v3720_v28 = vld [vmem:[%s5116_s1 + $0x68] ss:$12 sps:$4 sm:$0xff]  }
  0x59   :  { %2497 = vmatprep.subr.bf16.mxu0 %v3635_v29  ;;  %v3723_v29 = vld [vmem:[%s5116_s1 + $0x67c] ss:$12 sps:$4 sm:$0xff]  }
  0x5b   :  { %2412 = vmatpush1.bf16.msra.mxu1 %v3630_v30  ;;  %v3724_v30 = vld [vmem:[%s5116_s1 + $0x140] ss:$12 sps:$4 sm:$0xff]  }
  0x5c   :  { %2498 = vmatpush1.bf16.msra.mxu0 %v3633_v31  ;;  %2413 = vmatprep.subr.bf16.mxu1 %v3638_v32  ;;  %v4475_v31 = vld [vmem:[%s5117_s0 + $0x24] ss:$56 sps:$4 sm:$0xff]  }
  0x5d   :  { %2499 = vmatprep.subr.bf16.mxu0 %v3641_v33  ;;  %v3721_v32 = vld [vmem:[%s5116_s1 + $0x678] ss:$12 sps:$4 sm:$0xff]   ;;  %v3725_v33 = vld [vmem:[%s5116_s1 + $0x80] ss:$12 sps:$4 sm:$0xff]  }
  0x5f   :  { %2414 = vmatpush1.bf16.msra.mxu1 %v3636_v36  ;;  %v3729_v36 = vld [vmem:[%s5116_s1 + $0x158] ss:$12 sps:$4 sm:$0xff]  }
  0x60   :  { %2500 = vmatpush1.bf16.msra.mxu0 %v3639_v37  ;;  %2415 = vmatprep.subr.bf16.mxu1 %v3644_v38  ;;  %v3726_v37 = vld [vmem:[%s5116_s1 + $0x690] ss:$12 sps:$4 sm:$0xff]   ;;  %v3730_v38 = vld [vmem:[%s5116_s1 + $0x98] ss:$12 sps:$4 sm:$0xff]  }
  0x61   :  { %2501 = vmatprep.subr.bf16.mxu0 %v3647_v39  ;;  %v3733_v39 = vld [vmem:[%s5116_s1 + $0x6ac] ss:$12 sps:$4 sm:$0xff]  }
  0x63   :  { %2416 = vmatpush1.bf16.msra.mxu1 %v3642_v40  ;;  %v3734_v40 = vld [vmem:[%s5116_s1 + $0x170] ss:$12 sps:$4 sm:$0xff]  }
  0x64   :  { %2502 = vmatpush1.bf16.msra.mxu0 %v3645_v41  ;;  %2417 = vmatprep.subr.bf16.mxu1 %v3650_v42  ;;  %v3731_v41 = vld [vmem:[%s5116_s1 + $0x6a8] ss:$12 sps:$4 sm:$0xff]   ;;  %v3735_v42 = vld [vmem:[%s5116_s1 + $0xb0] ss:$12 sps:$4 sm:$0xff]  }
  0x65   :  { %2503 = vmatprep.subr.bf16.mxu0 %v3653_v43  ;;  %v3738_v43 = vld [vmem:[%s5116_s1 + $0x6c4] ss:$12 sps:$4 sm:$0xff]  }
  0x67   :  { %2418 = vmatpush1.bf16.msra.mxu1 %v3648_v44  ;;  %v3739_v44 = vld [vmem:[%s5116_s1 + $0x248] ss:$12 sps:$4 sm:$0xff]  }
  0x68   :  { %2504 = vmatpush1.bf16.msra.mxu0 %v3651_v45  ;;  %2419 = vmatprep.subr.bf16.mxu1 %v3656_v46  ;;  %v3736_v45 = vld [vmem:[%s5116_s1 + $0x6c0] ss:$12 sps:$4 sm:$0xff]   ;;  %v3740_v46 = vld [vmem:[%s5116_s1 + $0x188] ss:$12 sps:$4 sm:$0xff]  }
  0x69   :  { %2505 = vmatprep.subr.bf16.mxu0 %v3659_v47  ;;  %v3743_v47 = vld [vmem:[%s5116_s1 + $0x6dc] ss:$12 sps:$4 sm:$0xff]  }
  0x6b   :  { %2420 = vmatpush1.bf16.msra.mxu1 %v3654_v49  ;;  %v3744_v49 = vld [vmem:[%s5116_s1 + $0x260] ss:$12 sps:$4 sm:$0xff]  }
  0x6c   :  { %2506 = vmatpush1.bf16.msra.mxu0 %v3657_v50  ;;  %2421 = vmatprep.subr.bf16.mxu1 %v3662_v51  ;;  %v3741_v50 = vld [vmem:[%s5116_s1 + $0x6d8] ss:$12 sps:$4 sm:$0xff]   ;;  %v3745_v51 = vld [vmem:[%s5116_s1 + $0x1a0] ss:$12 sps:$4 sm:$0xff]  }
  0x6d   :  { %2507 = vmatprep.subr.bf16.mxu0 %v3665_v52  ;;  %v3748_v52 = vld [vmem:[%s5116_s1 + $0x6f4] ss:$12 sps:$4 sm:$0xff]  }
  0x6f   :  { %2422 = vmatpush1.bf16.msra.mxu1 %v3660_v53  ;;  %v3749_v53 = vld [vmem:[%s5116_s1 + $0x278] ss:$12 sps:$4 sm:$0xff]  }
  0x70   :  { %2508 = vmatpush1.bf16.msra.mxu0 %v3663_v54  ;;  %2423 = vmatprep.subr.bf16.mxu1 %v3668_v55  ;;  %v3750_v54 = vld [vmem:[%s5116_s1 + $0x1b8] ss:$12 sps:$4 sm:$0xff]  }
  0x71   :  { %2509 = vmatprep.subr.bf16.mxu0 %v3671_v56  ;;  %v3753_v55 = vld [vmem:[%s5116_s1 + $0x70c] ss:$12 sps:$4 sm:$0xff]   ;;  %v3751_v56 = vld [vmem:[%s5116_s1 + $0x708] ss:$12 sps:$4 sm:$0xff]  }
  0x73   :  { %2424 = vmatpush1.bf16.msra.mxu1 %v3666_v57  ;;  %v3755_v57 = vld [vmem:[%s5116_s1 + $0x1d0] ss:$12 sps:$4 sm:$0xff]  }
  0x74   :  { %2510 = vmatpush1.bf16.msra.mxu0 %v3669_v58  ;;  %2425 = vmatprep.subr.bf16.mxu1 %v3674_v59  ;;  %v3758_v58 = vld [vmem:[%s5116_s1 + $0x724] ss:$12 sps:$4 sm:$0xff]   ;;  %v3759_v59 = vld [vmem:[%s5116_s1 + $0x2a8] ss:$12 sps:$4 sm:$0xff]  }
  0x75   :  { %2511 = vmatprep.subr.bf16.mxu0 %v3677_v60  ;;  %v3756_v60 = vld [vmem:[%s5116_s1 + $0x720] ss:$12 sps:$4 sm:$0xff]  }
  0x77   :  { %2426 = vmatpush1.bf16.msra.mxu1 %v3672_v61  ;;  %v3760_v61 = vld [vmem:[%s5116_s1 + $0x1e8] ss:$12 sps:$4 sm:$0xff]  }
  0x78   :  { %2512 = vmatpush1.bf16.msra.mxu0 %v3675_v62  ;;  %2427 = vmatprep.subr.bf16.mxu1 %v3680_v63  ;;  %v3763_v62 = vld [vmem:[%s5116_s1 + $0x73c] ss:$12 sps:$4 sm:$0xff]   ;;  %v3764_v63 = vld [vmem:[%s5116_s1 + $0x2c0] ss:$12 sps:$4 sm:$0xff]  }
  0x79   :  { %2513 = vmatprep.subr.bf16.mxu0 %v3683_v0  ;;  %v3761_v0 = vld [vmem:[%s5116_s1 + $0x738] ss:$12 sps:$4 sm:$0xff]  }
  0x7b   :  { %2428 = vmatpush1.bf16.msra.mxu1 %v3678_v1  ;;  %v3765_v1 = vld [vmem:[%s5116_s1 + $0x200] ss:$12 sps:$4 sm:$0xff]  }
  0x7c   :  { %2514 = vmatpush1.bf16.msra.mxu0 %v3681_v2  ;;  %2429 = vmatprep.subr.bf16.mxu1 %v3686_v3  ;;  %v3768_v2 = vld [vmem:[%s5116_s1 + $0x754] ss:$12 sps:$4 sm:$0xff]   ;;  %v3769_v3 = vld [vmem:[%s5116_s1 + $0x2d8] ss:$12 sps:$4 sm:$0xff]  }
  0x7d   :  { %2515 = vmatprep.subr.bf16.mxu0 %v3689_v5  ;;  %v3766_v5 = vld [vmem:[%s5116_s1 + $0x750] ss:$12 sps:$4 sm:$0xff]  }
  0x7f   :  { %2430 = vmatpush1.bf16.msra.mxu1 %v3684_v6  ;;  %v3770_v6 = vld [vmem:[%s5116_s1 + $0x218] ss:$12 sps:$4 sm:$0xff]  }
  0x80   :  { %2516 = vmatpush1.bf16.msra.mxu0 %v3687_v7  ;;  %3310 = vmatprep.subr.bf16.mxu1 %v3699_v10  ;;  %v3773_v7 = vld [vmem:[%s5116_s1 + $0x76c] ss:$12 sps:$4 sm:$0xff]   ;;  %v3771_v10 = vld [vmem:[%s5116_s1 + $0x768] ss:$12 sps:$4 sm:$0xff]  }
  0x81   :  { %2528 = vmatprep.subr.bf16.mxu0 %v3698_v8  ;;  %v3774_v8 = vld [vmem:[%s5116_s1 + $0x2f0] ss:$12 sps:$4 sm:$0xff]  }
  0x82   :  { %2432 = vmatmul.mubr.bf16.vlgmr.msra.gmra.mrb[0].mxu1 %v4402_v9 }
  0x83   :  { %2518 = vmatmul.mubr.bf16.vlgmr.msra.gmra.mrb[0].mxu0 %v3693_v11  ;;  %3311 = vmatpush3.bf16.msra.mxu1 %v3700_v13  ;;  %v3775_v11 = vld [vmem:[%s5116_s1 + $0x230] ss:$12 sps:$4 sm:$0xff]  }
  0x84   :  { %2529 = vmatpush1.bf16.msra.mxu0 %v3696_v12  ;;  %3312 = vmatprep.subr.bf16.mxu1 %v3704_v15  ;;  %v4609_v12 = vld [vmem:[%s5117_s0 + $0x20] ss:$56 sps:$4 sm:$0xff]   ;;  %v3781_v13 = vld [vmem:[%s5116_s1 + $0x784] ss:$12 sps:$4 sm:$0xff]  }
  0x85   :  { %2530 = vmatprep.subr.bf16.mxu0 %v3703_v14  ;;  %2689 = vmatprep.mubr.bf16.mxu1 %v4132_v48  ;;  %v3711_v48 = vld [vmem:[%s5116_s1 + $0x648] ss:$12 sps:$4 sm:$0xff]   ;;  %v3779_v15 = vld [vmem:[%s5116_s1 + $0x780] ss:$12 sps:$4 sm:$0xff]  }
  0x86   :  { %2560 = vmatprep.mubr.bf16.mxu0 %v4475_v31  ;;  %v3782_v14 = vld [vmem:[%s5116_s1 + $0x3c8] ss:$12 sps:$4 sm:$0xff]  }
  0x87   :  { %3313 = vmatpush3.bf16.msra.mxu1 %v3705_v17  ;;  %v3786_v17 = vld [vmem:[%s5116_s1 + $0x79c] ss:$12 sps:$4 sm:$0xff]  }
  0x88   :  { %2531 = vmatpush1.bf16.msra.mxu0 %v3701_v16  ;;  %3314 = vmatprep.subr.bf16.mxu1 %v3709_v19  ;;  %v3783_v16 = vld [vmem:[%s5116_s1 + $0x308] ss:$12 sps:$4 sm:$0xff]   ;;  %v3784_v19 = vld [vmem:[%s5116_s1 + $0x798] ss:$12 sps:$4 sm:$0xff]  }
  0x89   :  { %2532 = vmatprep.subr.bf16.mxu0 %v3708_v18  ;;  %v3787_v18 = vld [vmem:[%s5116_s1 + $0x3e0] ss:$12 sps:$4 sm:$0xff]  }
  0x8b   :  { %3315 = vmatpush3.bf16.msra.mxu1 %v3710_v21  ;;  %v3791_v21 = vld [vmem:[%s5116_s1 + $0x7b4] ss:$12 sps:$4 sm:$0xff]  }
  0x8c   :  { %2533 = vmatpush1.bf16.msra.mxu0 %v3706_v20  ;;  %3316 = vmatprep.subr.bf16.mxu1 %v3714_v23  ;;  %v3788_v20 = vld [vmem:[%s5116_s1 + $0x320] ss:$12 sps:$4 sm:$0xff]  }
  0x8d   :  { %2534 = vmatprep.subr.bf16.mxu0 %v3713_v22  ;;  %v3789_v22 = vld [vmem:[%s5116_s1 + $0x7b0] ss:$12 sps:$4 sm:$0xff]   ;;  %v3961_v23 = vld [vmem:[%s5117_s0 + $0x14] ss:$56 sps:$4 sm:$0xff]  }
  0x8f   :  { %3317 = vmatpush3.bf16.msra.mxu1 %v3715_v24  ;;  %v4655_v24 = vld [vmem:[%s5117_s0 + $0x2c] ss:$56 sps:$4 sm:$0xff]  }
  0x90   :  { %2535 = vmatpush1.bf16.msra.mxu0 %v3711_v48  ;;  %3318 = vmatprep.subr.bf16.mxu1 %v3719_v26  ;;  %v3793_v48 = vld [vmem:[%s5116_s1 + $0x338] ss:$12 sps:$4 sm:$0xff]   ;;  %v3797_v26 = vld [vmem:[%s5116_s1 + $0x410] ss:$12 sps:$4 sm:$0xff]  }
  0x91   :  { %2536 = vmatprep.subr.bf16.mxu0 %v3718_v25  ;;  %v3796_v25 = vld [vmem:[%s5116_s1 + $0x7cc] ss:$12 sps:$4 sm:$0xff]  }
  0x93   :  { %3319 = vmatpush3.bf16.msra.mxu1 %v3720_v28  ;;  %v3798_v28 = vld [vmem:[%s5116_s1 + $0x350] ss:$12 sps:$4 sm:$0xff]  }
  0x94   :  { %2537 = vmatpush1.bf16.msra.mxu0 %v3716_v27  ;;  %3320 = vmatprep.subr.bf16.mxu1 %v3724_v30  ;;  %v3794_v27 = vld [vmem:[%s5116_s1 + $0x7c8] ss:$12 sps:$4 sm:$0xff]  }
  0x95   :  { %2538 = vmatprep.subr.bf16.mxu0 %v3723_v29  ;;  %v3801_v29 = vld [vmem:[%s5116_s1 + $0x7e4] ss:$12 sps:$4 sm:$0xff]   ;;  %v3802_v30 = vld [vmem:[%s5116_s1 + $0x428] ss:$12 sps:$4 sm:$0xff]  }
  0x97   :  { %3321 = vmatpush3.bf16.msra.mxu1 %v3725_v33  ;;  %v3803_v33 = vld [vmem:[%s5116_s1 + $0x368] ss:$12 sps:$4 sm:$0xff]  }
  0x98   :  { %2539 = vmatpush1.bf16.msra.mxu0 %v3721_v32  ;;  %3322 = vmatprep.subr.bf16.mxu1 %v3729_v36  ;;  %v3799_v32 = vld [vmem:[%s5116_s1 + $0x7e0] ss:$12 sps:$4 sm:$0xff]  }
  0x99   :  { %2540 = vmatprep.subr.bf16.mxu0 %v3728_v35  ;;  %v3806_v35 = vld [vmem:[%s5116_s1 + $0x7fc] ss:$12 sps:$4 sm:$0xff]   ;;  %v3807_v36 = vld [vmem:[%s5116_s1 + $0x440] ss:$12 sps:$4 sm:$0xff]  }
  0x9b   :  { %3323 = vmatpush3.bf16.msra.mxu1 %v3730_v38  ;;  %v3808_v38 = vld [vmem:[%s5116_s1 + $0x380] ss:$12 sps:$4 sm:$0xff]  }
  0x9c   :  { %2541 = vmatpush1.bf16.msra.mxu0 %v3726_v37  ;;  %3324 = vmatprep.subr.bf16.mxu1 %v3734_v40  ;;  %v3804_v37 = vld [vmem:[%s5116_s1 + $0x7f8] ss:$12 sps:$4 sm:$0xff]  }
  0x9d   :  { %2542 = vmatprep.subr.bf16.mxu0 %v3733_v39  ;;  %v3811_v39 = vld [vmem:[%s5116_s1 + $0x814] ss:$12 sps:$4 sm:$0xff]   ;;  %v3812_v40 = vld [vmem:[%s5116_s1 + $0x458] ss:$12 sps:$4 sm:$0xff]  }
  0x9f   :  { %3325 = vmatpush3.bf16.msra.mxu1 %v3735_v42  ;;  %v3813_v42 = vld [vmem:[%s5116_s1 + $0x398] ss:$12 sps:$4 sm:$0xff]  }
  0xa0   :  { %2543 = vmatpush1.bf16.msra.mxu0 %v3731_v41  ;;  %3332 = vmatprep.subr.bf16.mxu1 %v3739_v44  ;;  %v3809_v41 = vld [vmem:[%s5116_s1 + $0x810] ss:$12 sps:$4 sm:$0xff]  }
  0xa1   :  { %2544 = vmatprep.subr.bf16.mxu0 %v3738_v43  ;;  %v3816_v43 = vld [vmem:[%s5116_s1 + $0x82c] ss:$12 sps:$4 sm:$0xff]   ;;  %v3817_v44 = vld [vmem:[%s5116_s1 + $0x470] ss:$12 sps:$4 sm:$0xff]  }
  0xa2   :  { %2690 = vmatmul.mubr.bf16.vlgmr.msra.gmra.mrb[4].mxu1 %v4195_v4  ;;  %v3746_v4 = vld [vmem:[%s5116_s1 + $0x6f0] ss:$12 sps:$4 sm:$0xff]  }
  0xa3   :  { %3333 = vmatpush3.bf16.msra.mxu1 %v3740_v46  ;;  %2730 = vmatprep.mubr.bf16.mxu1 %v4288_v34  ;;  %v3754_v34 = vld [vmem:[%s5116_s1 + $0x290] ss:$12 sps:$4 sm:$0xff]  }
  0xa4   :  { %2545 = vmatpush1.bf16.msra.mxu0 %v3736_v45  ;;  %3334 = vmatprep.subr.bf16.mxu1 %v3744_v49  ;;  %v3814_v45 = vld [vmem:[%s5116_s1 + $0x828] ss:$12 sps:$4 sm:$0xff]   ;;  %v3818_v46 = vld [vmem:[%s5116_s1 + $0x3b0] ss:$12 sps:$4 sm:$0xff]  }
  0xa5   :  { %2546 = vmatprep.subr.bf16.mxu0 %v3743_v47  ;;  %v3821_v47 = vld [vmem:[%s5116_s1 + $0x844] ss:$12 sps:$4 sm:$0xff]   ;;  %v3822_v49 = vld [vmem:[%s5116_s1 + $0x548] ss:$12 sps:$4 sm:$0xff]  }
  0xa7   :  { %3335 = vmatpush3.bf16.msra.mxu1 %v3745_v51  ;;  %v3823_v51 = vld [vmem:[%s5116_s1 + $0x488] ss:$12 sps:$4 sm:$0xff]  }
  0xa8   :  { %2547 = vmatpush1.bf16.msra.mxu0 %v3741_v50  ;;  %3336 = vmatprep.subr.bf16.mxu1 %v3749_v53  ;;  %v3819_v50 = vld [vmem:[%s5116_s1 + $0x840] ss:$12 sps:$4 sm:$0xff]  }
  0xa9   :  { %2548 = vmatprep.subr.bf16.mxu0 %v3748_v52  ;;  %v3826_v52 = vld [vmem:[%s5116_s1 + $0x85c] ss:$12 sps:$4 sm:$0xff]   ;;  %v3827_v53 = vld [vmem:[%s5116_s1 + $0x560] ss:$12 sps:$4 sm:$0xff]  }
  0xab   :  { %3337 = vmatpush3.bf16.msra.mxu1 %v3750_v54  ;;  %v3824_v54 = vld [vmem:[%s5116_s1 + $0x858] ss:$12 sps:$4 sm:$0xff]  }
  0xac   :  { %2549 = vmatpush1.bf16.msra.mxu0 %v3746_v4  ;;  %3338 = vmatprep.subr.bf16.mxu1 %v3754_v34  ;;  %v3962_v4 = vld [vmem:[%s5117_s0 + $0x10] ss:$56 sps:$4 sm:$0xff]   ;;  %v3831_v34 = vld [vmem:[%s5116_s1 + $0x874] ss:$12 sps:$4 sm:$0xff]  }
  0xad   :  { %2550 = vmatprep.subr.bf16.mxu0 %v3753_v55  ;;  %v3828_v55 = vld [vmem:[%s5116_s1 + $0x4a0] ss:$12 sps:$4 sm:$0xff]  }
  0xaf   :  { %3339 = vmatpush3.bf16.msra.mxu1 %v3755_v57  ;;  %v3829_v57 = vld [vmem:[%s5116_s1 + $0x870] ss:$12 sps:$4 sm:$0xff]  }
  0xb0   :  { %2551 = vmatpush1.bf16.msra.mxu0 %v3751_v56  ;;  %3340 = vmatprep.subr.bf16.mxu1 %v3759_v59  ;;  %v3832_v56 = vld [vmem:[%s5116_s1 + $0x578] ss:$12 sps:$4 sm:$0xff]  }
  0xb1   :  { %2552 = vmatprep.subr.bf16.mxu0 %v3758_v58  ;;  %v3963_v58 = vld [vmem:[%s5117_s0 + $0x1c] ss:$56 sps:$4 sm:$0xff]   ;;  %v3833_v59 = vld [vmem:[%s5116_s1 + $0x4b8] ss:$12 sps:$4 sm:$0xff]  }
  0xb3   :  { %3341 = vmatpush3.bf16.msra.mxu1 %v3760_v61  ;;  %v3837_v61 = vld [vmem:[%s5116_s1 + $0x590] ss:$12 sps:$4 sm:$0xff]  }
  0xb4   :  { %2553 = vmatpush1.bf16.msra.mxu0 %v3756_v60  ;;  %3342 = vmatprep.subr.bf16.mxu1 %v3764_v63  ;;  %v3836_v60 = vld [vmem:[%s5116_s1 + $0x88c] ss:$12 sps:$4 sm:$0xff]   ;;  %v3838_v63 = vld [vmem:[%s5116_s1 + $0x4d0] ss:$12 sps:$4 sm:$0xff]  }
  0xb5   :  { %2554 = vmatprep.subr.bf16.mxu0 %v3763_v62  ;;  %v3834_v62 = vld [vmem:[%s5116_s1 + $0x888] ss:$12 sps:$4 sm:$0xff]  }
  0xb7   :  { %3343 = vmatpush3.bf16.msra.mxu1 %v3765_v1  ;;  %v3842_v1 = vld [vmem:[%s5116_s1 + $0x5a8] ss:$12 sps:$4 sm:$0xff]  }
  0xb8   :  { %2555 = vmatpush1.bf16.msra.mxu0 %v3761_v0  ;;  %3344 = vmatprep.subr.bf16.mxu1 %v3769_v3  ;;  %v3841_v0 = vld [vmem:[%s5116_s1 + $0x8a4] ss:$12 sps:$4 sm:$0xff]   ;;  %v3843_v3 = vld [vmem:[%s5116_s1 + $0x4e8] ss:$12 sps:$4 sm:$0xff]  }
  0xb9   :  { %2556 = vmatprep.subr.bf16.mxu0 %v3768_v2  ;;  %v3839_v2 = vld [vmem:[%s5116_s1 + $0x8a0] ss:$12 sps:$4 sm:$0xff]  }
  0xbb   :  { %3345 = vmatpush3.bf16.msra.mxu1 %v3770_v6  ;;  %v3847_v6 = vld [vmem:[%s5116_s1 + $0x5c0] ss:$12 sps:$4 sm:$0xff]  }
  0xbc   :  { %2557 = vmatpush1.bf16.msra.mxu0 %v3766_v5  ;;  %3346 = vmatprep.subr.bf16.mxu1 %v3774_v8  ;;  %v3846_v5 = vld [vmem:[%s5116_s1 + $0x8bc] ss:$12 sps:$4 sm:$0xff]   ;;  %v3848_v8 = vld [vmem:[%s5116_s1 + $0x500] ss:$12 sps:$4 sm:$0xff]  }
  0xbd   :  { %2558 = vmatprep.subr.bf16.mxu0 %v3773_v7  ;;  %v3844_v7 = vld [vmem:[%s5116_s1 + $0x8b8] ss:$12 sps:$4 sm:$0xff]  }
  0xbf   :  { %3347 = vmatpush3.bf16.msra.mxu1 %v3775_v11  ;;  %v3852_v11 = vld [vmem:[%s5116_s1 + $0x5d8] ss:$12 sps:$4 sm:$0xff]  }
  0xc0   :  { %2559 = vmatpush1.bf16.msra.mxu0 %v3771_v10  ;;  %3354 = vmatprep.subr.bf16.mxu1 %v3782_v14  ;;  %v3851_v10 = vld [vmem:[%s5116_s1 + $0x8d4] ss:$12 sps:$4 sm:$0xff]   ;;  %v3853_v14 = vld [vmem:[%s5116_s1 + $0x518] ss:$12 sps:$4 sm:$0xff]  }
  0xc1   :  { %2571 = vmatprep.subr.bf16.mxu0 %v3781_v13  ;;  %v3849_v13 = vld [vmem:[%s5116_s1 + $0x8d0] ss:$12 sps:$4 sm:$0xff]  }
  0xc2   :  { %2731 = vmatmul.mubr.bf16.vlgmr.msra.gmra.mrb[8].mxu1 %v4402_v9  ;;  %v3792_v9 = vld [vmem:[%s5116_s1 + $0x3f8] ss:$12 sps:$4 sm:$0xff]  }
  0xc3   :  { %2561 = vmatmul.mubr.bf16.vlgmr.msra.gmra.mrb[0].mxu0 %v4609_v12  ;;  %3355 = vmatpush3.bf16.msra.mxu1 %v3783_v16  ;;  %v3857_v16 = vld [vmem:[%s5116_s1 + $0x5f0] ss:$12 sps:$4 sm:$0xff]  }
  0xc4   :  { %2572 = vmatpush1.bf16.msra.mxu0 %v3779_v15  ;;  %3356 = vmatprep.subr.bf16.mxu1 %v3787_v18  ;;  %v3856_v15 = vld [vmem:[%s5116_s1 + $0x8ec] ss:$12 sps:$4 sm:$0xff]   ;;  %v3858_v18 = vld [vmem:[%s5116_s1 + $0x530] ss:$12 sps:$4 sm:$0xff]  }
  0xc5   :  { %2573 = vmatprep.subr.bf16.mxu0 %v3786_v17  ;;  %2771 = vmatprep.mubr.bf16.mxu1 %v3961_v23  ;;  %v3854_v17 = vld [vmem:[%s5116_s1 + $0x8e8] ss:$12 sps:$4 sm:$0xff]  }
  0xc6   :  { %2603 = vmatprep.mubr.bf16.mxu0 %v4655_v24  ;;  %v3869_v23 = vld [vmem:[%s5116_s1 + $0x91c] ss:$12 sps:$4 sm:$0xff]  }
  0xc7   :  { %3357 = vmatpush3.bf16.msra.mxu1 %v3788_v20  ;;  %v3865_v20 = vld [vmem:[%s5116_s1 + $0x6c8] ss:$12 sps:$4 sm:$0xff]  }
  0xc8   :  { %2574 = vmatpush1.bf16.msra.mxu0 %v3784_v19  ;;  %3358 = vmatprep.subr.bf16.mxu1 %v3792_v9  ;;  %v3864_v19 = vld [vmem:[%s5116_s1 + $0x904] ss:$12 sps:$4 sm:$0xff]   ;;  %v3862_v9 = vld [vmem:[%s5116_s1 + $0x900] ss:$12 sps:$4 sm:$0xff]  }
  0xc9   :  { %2575 = vmatprep.subr.bf16.mxu0 %v3791_v21  ;;  %v4829_v21 = vld [vmem:[%s5117_s0 + $0x28] ss:$56 sps:$4 sm:$0xff]  }
  0xcb   :  { %3359 = vmatpush3.bf16.msra.mxu1 %v3793_v48  ;;  %v3870_v48 = vld [vmem:[%s5116_s1 + $0x6e0] ss:$12 sps:$4 sm:$0xff]  }
  0xcc   :  { %2576 = vmatpush1.bf16.msra.mxu0 %v3789_v22  ;;  %3360 = vmatprep.subr.bf16.mxu1 %v3797_v26  ;;  %v3866_v22 = vld [vmem:[%s5116_s1 + $0x608] ss:$12 sps:$4 sm:$0xff]  }
  0xcd   :  { %2577 = vmatprep.subr.bf16.mxu0 %v3796_v25  ;;  %v3867_v25 = vld [vmem:[%s5116_s1 + $0x918] ss:$12 sps:$4 sm:$0xff]   ;;  %v4849_v26 = vld [vmem:[%s5117_s0 + $0x34] ss:$56 sps:$4 sm:$0xff]  }
  0xcf   :  { %3361 = vmatpush3.bf16.msra.mxu1 %v3798_v28  ;;  %v3871_v28 = vld [vmem:[%s5116_s1 + $0x620] ss:$12 sps:$4 sm:$0xff]  }
  0xd0   :  { %2578 = vmatpush1.bf16.msra.mxu0 %v3794_v27  ;;  %3362 = vmatprep.subr.bf16.mxu1 %v3802_v30  ;;  %v3964_v27 = vld [vmem:[%s5117_s0 + $0x18] ss:$56 sps:$4 sm:$0xff]  }
  0xd1   :  { %2579 = vmatprep.subr.bf16.mxu0 %v3801_v29  ;;  %v3874_v29 = vld [vmem:[%s5116_s1 + $0x934] ss:$12 sps:$4 sm:$0xff]   ;;  %v3875_v30 = vld [vmem:[%s5116_s1 + $0x6f8] ss:$12 sps:$4 sm:$0xff]  }
  0xd3   :  { %3363 = vmatpush3.bf16.msra.mxu1 %v3803_v33  ;;  %v3876_v33 = vld [vmem:[%s5116_s1 + $0x638] ss:$12 sps:$4 sm:$0xff]  }
  0xd4   :  { %2580 = vmatpush1.bf16.msra.mxu0 %v3799_v32  ;;  %3364 = vmatprep.subr.bf16.mxu1 %v3807_v36  ;;  %v3872_v32 = vld [vmem:[%s5116_s1 + $0x930] ss:$12 sps:$4 sm:$0xff]   ;;  %v3877_v36 = vld [vmem:[%s5116_s1 + $0x948] ss:$12 sps:$4 sm:$0xff]  }
  0xd5   :  { %2581 = vmatprep.subr.bf16.mxu0 %v3806_v35  ;;  %v3879_v35 = vld [vmem:[%s5116_s1 + $0x94c] ss:$12 sps:$4 sm:$0xff]  }
  0xd7   :  { %3365 = vmatpush3.bf16.msra.mxu1 %v3808_v38  ;;  %v3884_v38 = vld [vmem:[%s5116_s1 + $0x964] ss:$12 sps:$4 sm:$0xff]  }
  0xd8   :  { %2582 = vmatpush1.bf16.msra.mxu0 %v3804_v37  ;;  %3366 = vmatprep.subr.bf16.mxu1 %v3812_v40  ;;  %v3881_v37 = vld [vmem:[%s5116_s1 + $0x650] ss:$12 sps:$4 sm:$0xff]   ;;  %v3882_v40 = vld [vmem:[%s5116_s1 + $0x960] ss:$12 sps:$4 sm:$0xff]  }
  0xd9   :  { %2583 = vmatprep.subr.bf16.mxu0 %v3811_v39  ;;  %v3885_v39 = vld [vmem:[%s5116_s1 + $0x728] ss:$12 sps:$4 sm:$0xff]  }
  0xdb   :  { %3367 = vmatpush3.bf16.msra.mxu1 %v3813_v42  ;;  %v3889_v42 = vld [vmem:[%s5116_s1 + $0x97c] ss:$12 sps:$4 sm:$0xff]  }
  0xdc   :  { %2584 = vmatpush1.bf16.msra.mxu0 %v3809_v41  ;;  %3368 = vmatprep.subr.bf16.mxu1 %v3817_v44  ;;  %v3886_v41 = vld [vmem:[%s5116_s1 + $0x668] ss:$12 sps:$4 sm:$0xff]   ;;  %v3887_v44 = vld [vmem:[%s5116_s1 + $0x978] ss:$12 sps:$4 sm:$0xff]  }
  0xdd   :  { %2585 = vmatprep.subr.bf16.mxu0 %v3816_v43  ;;  %v3890_v43 = vld [vmem:[%s5116_s1 + $0x740] ss:$12 sps:$4 sm:$0xff]  }
  0xdf   :  { %3369 = vmatpush3.bf16.msra.mxu1 %v3818_v46  ;;  %v3894_v46 = vld [vmem:[%s5116_s1 + $0x994] ss:$12 sps:$4 sm:$0xff]  }
  0xe0   :  { %2586 = vmatpush1.bf16.msra.mxu0 %v3814_v45  ;;  %3376 = vmatprep.subr.bf16.mxu1 %v3822_v49  ;;  %v3891_v45 = vld [vmem:[%s5116_s1 + $0x680] ss:$12 sps:$4 sm:$0xff]   ;;  %v3892_v49 = vld [vmem:[%s5116_s1 + $0x990] ss:$12 sps:$4 sm:$0xff]  }
  0xe1   :  { %2587 = vmatprep.subr.bf16.mxu0 %v3821_v47  ;;  %v3895_v47 = vld [vmem:[%s5116_s1 + $0x758] ss:$12 sps:$4 sm:$0xff]  }
  0xe2   :  { %2772 = vmatmul.mubr.bf16.vlgmr.msra.gmra.mrb[12].mxu1 %v3962_v4  ;;  %v3901_v4 = vld [vmem:[%s5116_s1 + $0x6b0] ss:$12 sps:$4 sm:$0xff]  }
  0xe3   :  { %3377 = vmatpush3.bf16.msra.mxu1 %v3823_v51  ;;  %2812 = vmatprep.mubr.bf16.mxu1 %v3963_v58  ;;  %v3899_v51 = vld [vmem:[%s5116_s1 + $0x9ac] ss:$12 sps:$4 sm:$0xff]  }
  0xe4   :  { %2588 = vmatpush1.bf16.msra.mxu0 %v3819_v50  ;;  %3378 = vmatprep.subr.bf16.mxu1 %v3827_v53  ;;  %v3896_v50 = vld [vmem:[%s5116_s1 + $0x698] ss:$12 sps:$4 sm:$0xff]   ;;  %v3897_v53 = vld [vmem:[%s5116_s1 + $0x9a8] ss:$12 sps:$4 sm:$0xff]   ;;  %v3910_v58 = vld [vmem:[%s5116_s1 + $0x860] ss:$12 sps:$4 sm:$0xff]  }
  0xe5   :  { %2589 = vmatprep.subr.bf16.mxu0 %v3826_v52  ;;  %v3900_v52 = vld [vmem:[%s5116_s1 + $0x770] ss:$12 sps:$4 sm:$0xff]  }
  0xe7   :  { %3379 = vmatpush3.bf16.msra.mxu1 %v3828_v55  ;;  %v3905_v55 = vld [vmem:[%s5116_s1 + $0x848] ss:$12 sps:$4 sm:$0xff]  }
  0xe8   :  { %2590 = vmatpush1.bf16.msra.mxu0 %v3824_v54  ;;  %3380 = vmatprep.subr.bf16.mxu1 %v3832_v56  ;;  %v3904_v54 = vld [vmem:[%s5116_s1 + $0x9c4] ss:$12 sps:$4 sm:$0xff]   ;;  %v3906_v56 = vld [vmem:[%s5116_s1 + $0x788] ss:$12 sps:$4 sm:$0xff]  }
  0xe9   :  { %2591 = vmatprep.subr.bf16.mxu0 %v3831_v34  ;;  %v3902_v34 = vld [vmem:[%s5116_s1 + $0x9c0] ss:$12 sps:$4 sm:$0xff]  }
  0xeb   :  { %3381 = vmatpush3.bf16.msra.mxu1 %v3833_v59  ;;  %v3907_v59 = vld [vmem:[%s5116_s1 + $0x9d8] ss:$12 sps:$4 sm:$0xff]  }
  0xec   :  { %2592 = vmatpush1.bf16.msra.mxu0 %v3829_v57  ;;  %3382 = vmatprep.subr.bf16.mxu1 %v3837_v61  ;;  %v3909_v57 = vld [vmem:[%s5116_s1 + $0x9dc] ss:$12 sps:$4 sm:$0xff]   ;;  %v3914_v61 = vld [vmem:[%s5116_s1 + $0x9f4] ss:$12 sps:$4 sm:$0xff]  }
  0xed   :  { %2593 = vmatprep.subr.bf16.mxu0 %v3836_v60  ;;  %v3911_v60 = vld [vmem:[%s5116_s1 + $0x7a0] ss:$12 sps:$4 sm:$0xff]  }
  0xef   :  { %3383 = vmatpush3.bf16.msra.mxu1 %v3838_v63  ;;  %v3916_v63 = vld [vmem:[%s5116_s1 + $0x7b8] ss:$12 sps:$4 sm:$0xff]  }
  0xf0   :  { %2594 = vmatpush1.bf16.msra.mxu0 %v3834_v62  ;;  %3384 = vmatprep.subr.bf16.mxu1 %v3842_v1  ;;  %v3912_v62 = vld [vmem:[%s5116_s1 + $0x9f0] ss:$12 sps:$4 sm:$0xff]   ;;  %v3917_v1 = vld [vmem:[%s5116_s1 + $0xa08] ss:$12 sps:$4 sm:$0xff]  }
  0xf1   :  { %2595 = vmatprep.subr.bf16.mxu0 %v3841_v0  ;;  %v3919_v0 = vld [vmem:[%s5116_s1 + $0xa0c] ss:$12 sps:$4 sm:$0xff]  }
  0xf3   :  { %3385 = vmatpush3.bf16.msra.mxu1 %v3843_v3  ;;  %v3924_v3 = vld [vmem:[%s5116_s1 + $0xa24] ss:$12 sps:$4 sm:$0xff]  }
  0xf4   :  { %2596 = vmatpush1.bf16.msra.mxu0 %v3839_v2  ;;  %3386 = vmatprep.subr.bf16.mxu1 %v3847_v6  ;;  %v3921_v2 = vld [vmem:[%s5116_s1 + $0x7d0] ss:$12 sps:$4 sm:$0xff]   ;;  %v3922_v6 = vld [vmem:[%s5116_s1 + $0xa20] ss:$12 sps:$4 sm:$0xff]  }
  0xf5   :  { %2597 = vmatprep.subr.bf16.mxu0 %v3846_v5  ;;  %v3925_v5 = vld [vmem:[%s5116_s1 + $0x8a8] ss:$12 sps:$4 sm:$0xff]  }
  0xf7   :  { %3387 = vmatpush3.bf16.msra.mxu1 %v3848_v8  ;;  %v3929_v8 = vld [vmem:[%s5116_s1 + $0xa3c] ss:$12 sps:$4 sm:$0xff]  }
  0xf8   :  { %2598 = vmatpush1.bf16.msra.mxu0 %v3844_v7  ;;  %3388 = vmatprep.subr.bf16.mxu1 %v3852_v11  ;;  %v3926_v7 = vld [vmem:[%s5116_s1 + $0x7e8] ss:$12 sps:$4 sm:$0xff]   ;;  %v3927_v11 = vld [vmem:[%s5116_s1 + $0xa38] ss:$12 sps:$4 sm:$0xff]  }
  0xf9   :  { %2599 = vmatprep.subr.bf16.mxu0 %v3851_v10  ;;  %v3930_v10 = vld [vmem:[%s5116_s1 + $0x8c0] ss:$12 sps:$4 sm:$0xff]  }
  0xfb   :  { %3389 = vmatpush3.bf16.msra.mxu1 %v3853_v14  ;;  %v3934_v14 = vld [vmem:[%s5116_s1 + $0xa54] ss:$12 sps:$4 sm:$0xff]  }
  0xfc   :  { %2600 = vmatpush1.bf16.msra.mxu0 %v3849_v13  ;;  %3390 = vmatprep.subr.bf16.mxu1 %v3857_v16  ;;  %v3931_v13 = vld [vmem:[%s5116_s1 + $0x800] ss:$12 sps:$4 sm:$0xff]   ;;  %v3932_v16 = vld [vmem:[%s5116_s1 + $0xa50] ss:$12 sps:$4 sm:$0xff]  }
  0xfd   :  { %2601 = vmatprep.subr.bf16.mxu0 %v3856_v15  ;;  %v3935_v15 = vld [vmem:[%s5116_s1 + $0x8d8] ss:$12 sps:$4 sm:$0xff]  }
  0xff   :  { %3391 = vmatpush3.bf16.msra.mxu1 %v3858_v18  ;;  %v3939_v18 = vld [vmem:[%s5116_s1 + $0xa6c] ss:$12 sps:$4 sm:$0xff]  }
 0x100   :  { %2602 = vmatpush1.bf16.msra.mxu0 %v3854_v17  ;;  %3398 = vmatprep.subr.bf16.mxu1 %v3865_v20  ;;  %v3936_v17 = vld [vmem:[%s5116_s1 + $0x818] ss:$12 sps:$4 sm:$0xff]   ;;  %v3937_v20 = vld [vmem:[%s5116_s1 + $0xa68] ss:$12 sps:$4 sm:$0xff]  }
 0x101   :  { %2614 = vmatprep.subr.bf16.mxu0 %v3864_v19  ;;  %v3940_v19 = vld [vmem:[%s5116_s1 + $0x8f0] ss:$12 sps:$4 sm:$0xff]  }
 0x102   :  { %2813 = vmatmul.mubr.bf16.vlgmr.msra.gmra.mrb[16].mxu1 %v3964_v27  ;;  %v3948_v27 = vld [vmem:[%s5116_s1 + $0x920] ss:$12 sps:$4 sm:$0xff]  }
 0x103   :  { %2604 = vmatmul.mubr.bf16.vlgmr.msra.gmra.mrb[0].mxu0 %v4829_v21  ;;  %3399 = vmatpush3.bf16.msra.mxu1 %v3866_v22  ;;  %v3945_v22 = vld [vmem:[%s5116_s1 + $0x9c8] ss:$12 sps:$4 sm:$0xff]  }
 0x104   :  { %2615 = vmatpush1.bf16.msra.mxu0 %v3862_v9  ;;  %3400 = vmatprep.subr.bf16.mxu1 %v3870_v48  ;;  %v3941_v9 = vld [vmem:[%s5116_s1 + $0x830] ss:$12 sps:$4 sm:$0xff]   ;;  %v3946_v48 = vld [vmem:[%s5116_s1 + $0x908] ss:$12 sps:$4 sm:$0xff]  }
 0x105   :  { %2616 = vmatprep.subr.bf16.mxu0 %v3869_v23  ;;  %2853 = vmatprep.mubr.bf16.mxu1 %v4475_v31  ;;  %v3880_v31 = vld [vmem:[%s5116_s1 + $0x710] ss:$12 sps:$4 sm:$0xff]  }
 0x106   :  { %2646 = vmatprep.mubr.bf16.mxu0 %v4849_v26  ;;  %v3942_v23 = vld [vmem:[%s5117_s0 + $0x30] ss:$56 sps:$4 sm:$0xff]  }
 0x107   :  { %3401 = vmatpush3.bf16.msra.mxu1 %v3871_v28  ;;  %v3949_v28 = vld [vmem:[%s5116_s1 + $0x9f8] ss:$12 sps:$4 sm:$0xff]  }
 0x108   :  { %2617 = vmatpush1.bf16.msra.mxu0 %v3867_v25  ;;  %3402 = vmatprep.subr.bf16.mxu1 %v3875_v30  ;;  %v3947_v25 = vld [vmem:[%s5116_s1 + $0x9e0] ss:$12 sps:$4 sm:$0xff]   ;;  %v3953_v30 = vld [vmem:[%s5116_s1 + $0xa28] ss:$12 sps:$4 sm:$0xff]  }
 0x109   :  { %2618 = vmatprep.subr.bf16.mxu0 %v3874_v29  ;;  %v3950_v29 = vld [vmem:[%s5116_s1 + $0x938] ss:$12 sps:$4 sm:$0xff]  }
 0x10b   :  { %3403 = vmatpush3.bf16.msra.mxu1 %v3876_v33  ;;  %v3955_v33 = vld [vmem:[%s5116_s1 + $0xa40] ss:$12 sps:$4 sm:$0xff]  }
 0x10c   :  { %2619 = vmatpush1.bf16.msra.mxu0 %v3872_v32  ;;  %3404 = vmatprep.subr.bf16.mxu1 %v3880_v31  ;;  %v3954_v32 = vld [vmem:[%s5116_s1 + $0x968] ss:$12 sps:$4 sm:$0xff]   ;;  %v3957_v31 = vld [vmem:[%s5116_s1 + $0xa58] ss:$12 sps:$4 sm:$0xff]  }
 0x10d   :  { %2620 = vmatprep.subr.bf16.mxu0 %v3879_v35  ;;  %v3956_v35 = vld [vmem:[%s5116_s1 + $0x980] ss:$12 sps:$4 sm:$0xff]  }
 0x10f   :  { %3405 = vmatpush3.bf16.msra.mxu1 %v3881_v37 }
 0x110   :  { %2621 = vmatpush1.bf16.msra.mxu0 %v3877_v36  ;;  %3406 = vmatprep.subr.bf16.mxu1 %v3885_v39  ;;  %v3958_v39 = vld [vmem:[%s5116_s1 + $0x998] ss:$12 sps:$4 sm:$0xff]  }
 0x111   :  { %2622 = vmatprep.subr.bf16.mxu0 %v3884_v38 }
 0x113   :  { %3407 = vmatpush3.bf16.msra.mxu1 %v3886_v41  ;;  %v3959_v41 = vld [vmem:[%s5116_s1 + $0xa70] ss:$12 sps:$4 sm:$0xff]  }
 0x114   :  { %2623 = vmatpush1.bf16.msra.mxu0 %v3882_v40  ;;  %3408 = vmatprep.subr.bf16.mxu1 %v3890_v43 }
 0x115   :  { %2624 = vmatprep.subr.bf16.mxu0 %v3889_v42  ;;  %v3960_v42 = vld [vmem:[%s5116_s1 + $0x9b0] ss:$12 sps:$4 sm:$0xff]  }
 0x117   :  { %3409 = vmatpush3.bf16.msra.mxu1 %v3891_v45 }
 0x118   :  { %2625 = vmatpush1.bf16.msra.mxu0 %v3887_v44  ;;  %3410 = vmatprep.subr.bf16.mxu1 %v3895_v47 }
 0x119   :  { %2626 = vmatprep.subr.bf16.mxu0 %v3894_v46 }
 0x11b   :  { %3411 = vmatpush3.bf16.msra.mxu1 %v3896_v50  ;;  %v479_v50 = vlaneseq }
 0x11c   :  { %2627 = vmatpush1.bf16.msra.mxu0 %v3892_v49  ;;  %3412 = vmatprep.subr.bf16.mxu1 %v3900_v52 }
 0x11d   :  { %2628 = vmatprep.subr.bf16.mxu0 %v3899_v51  ;;  %v480_v51 = vshrl.u32 %v479_v50, 7 }
 0x11f   :  { %3413 = vmatpush3.bf16.msra.mxu1 %v3901_v4  ;;  %v489_v52 = vsub.s32 2, %v480_v51 }
 0x120   :  { %2629 = vmatpush1.bf16.msra.mxu0 %v3897_v53  ;;  %3420 = vmatprep.subr.bf16.mxu1 %v3905_v55  ;;  %v477_v53 = vld [vmem:[%s5118_s2] sm:$0x7] }
 0x121   :  { %2630 = vmatprep.subr.bf16.mxu0 %v3904_v54  ;;  %v490_v4 = vrot.slane %v477_v53, %v489_v52 }
 0x122   :  { %2854 = vmatmul.mubr.bf16.vlgmr.msra.gmra.mrb[20].mxu1 %v4609_v12  ;;  %v3915_v12 = vld [vmem:[%s5116_s1 + $0x878] ss:$12 sps:$4 sm:$0xff]  }
 0x123   :  { %3421 = vmatpush3.bf16.msra.mxu1 %v3906_v56  ;;  %2894 = vmatprep.mubr.bf16.mxu1 %v4655_v24  ;;  %v3920_v24 = vld [vmem:[%s5116_s1 + $0x890] ss:$12 sps:$4 sm:$0xff]  }
 0x124   :  { %2631 = vmatpush1.bf16.msra.mxu0 %v3902_v34  ;;  %3422 = vmatprep.subr.bf16.mxu1 %v3910_v58 }
 0x125   :  { %2632 = vmatprep.subr.bf16.mxu0 %v3909_v57 }
 0x127   :  { %3423 = vmatpush3.bf16.msra.mxu1 %v3911_v60 }
 0x128   :  { %2633 = vmatpush1.bf16.msra.mxu0 %v3907_v59  ;;  %3424 = vmatprep.subr.bf16.mxu1 %v3915_v12 }
 0x129   :  { %2634 = vmatprep.subr.bf16.mxu0 %v3914_v61 }
 0x12b   :  { %3425 = vmatpush3.bf16.msra.mxu1 %v3916_v63 }
 0x12c   :  { %2635 = vmatpush1.bf16.msra.mxu0 %v3912_v62  ;;  %3426 = vmatprep.subr.bf16.mxu1 %v3920_v24 }
 0x12d   :  { %2636 = vmatprep.subr.bf16.mxu0 %v3919_v0 }
 0x12f   :  { %3427 = vmatpush3.bf16.msra.mxu1 %v3921_v2 }
 0x130   :  { %2637 = vmatpush1.bf16.msra.mxu0 %v3917_v1  ;;  %3428 = vmatprep.subr.bf16.mxu1 %v3925_v5 }
 0x131   :  { %2638 = vmatprep.subr.bf16.mxu0 %v3924_v3 }
 0x133   :  { %3429 = vmatpush3.bf16.msra.mxu1 %v3926_v7 }
 0x134   :  { %2639 = vmatpush1.bf16.msra.mxu0 %v3922_v6  ;;  %3430 = vmatprep.subr.bf16.mxu1 %v3930_v10 }
 0x135   :  { %2640 = vmatprep.subr.bf16.mxu0 %v3929_v8 }
 0x137   :  { %3431 = vmatpush3.bf16.msra.mxu1 %v3931_v13 }
 0x138   :  { %2641 = vmatpush1.bf16.msra.mxu0 %v3927_v11  ;;  %3432 = vmatprep.subr.bf16.mxu1 %v3935_v15 }
 0x139   :  { %2642 = vmatprep.subr.bf16.mxu0 %v3934_v14 }
 0x13b   :  { %3433 = vmatpush3.bf16.msra.mxu1 %v3936_v17 }
 0x13c   :  { %2643 = vmatpush1.bf16.msra.mxu0 %v3932_v16  ;;  %3434 = vmatprep.subr.bf16.mxu1 %v3940_v19 }
 0x13d   :  { %2644 = vmatprep.subr.bf16.mxu0 %v3939_v18 }
 0x13f   :  { %3435 = vmatpush3.bf16.msra.mxu1 %v3941_v9 }
 0x140   :  { %2645 = vmatpush1.bf16.msra.mxu0 %v3937_v20  ;;  %3442 = vmatprep.subr.bf16.mxu1 %v3945_v22 }
 0x142   :  { %2895 = vmatmul.mubr.bf16.vlgmr.msra.gmra.mrb[24].mxu1 %v4829_v21  ;;  %v3951_v21 = vld [vmem:[%s5116_s1 + $0xa10] ss:$12 sps:$4 sm:$0xff]  }
 0x143   :  { %2647 = vmatmul.mubr.bf16.vlgmr.msra.gmra.mrb[0].mxu0 %v3942_v23  ;;  %3443 = vmatpush3.bf16.msra.mxu1 %v3946_v48  ;;  %v481_v48 = vsub.s32 0, %v480_v51 }
 0x144   :  { %2935 = vmatprep.mubr.bf16.mxu1 %v4849_v26  ;;  %3444 = vmatprep.subr.bf16.mxu1 %v3947_v25  ;;  %v3952_v26 = vld [vmem:[%s5116_s1 + $0x950] ss:$12 sps:$4 sm:$0xff]   ;;  %v485_v25 = vsub.s32 1, %v480_v51 }
 0x147   :  { %3445 = vmatpush3.bf16.msra.mxu1 %v3948_v27  ;;  %v482_v27 = vrot.slane %v477_v53, %v481_v48 }
 0x148   :  { %3446 = vmatprep.subr.bf16.mxu1 %v3949_v28  ;;  %v486_v28 = vrot.slane %v477_v53, %v485_v25 }
 0x14b   :  { %3447 = vmatpush3.bf16.msra.mxu1 %v3950_v29 }
 0x14c   :  { %3448 = vmatprep.subr.bf16.mxu1 %v3951_v21 }
 0x14f   :  { %3449 = vmatpush3.bf16.msra.mxu1 %v3952_v26 }
 0x150   :  { %3450 = vmatprep.subr.bf16.mxu1 %v3953_v30 }
 0x153   :  { %3451 = vmatpush3.bf16.msra.mxu1 %v3954_v32 }
 0x154   :  { %3452 = vmatprep.subr.bf16.mxu1 %v3955_v33 }
 0x155   :  { %v5074_v36 = vpop.f32.mrb[0].mxu1 }
 0x156   :  { %v5076_v37 = vpop.f32.mrb[1].mxu1  ;;  %v3464_v29 = vadd.f32 %v5074_v36, %v482_v27 }
 0x157   :  { %v5078_v38 = vpop.f32.mrb[2].mxu1  ;;  %3453 = vmatpush3.bf16.msra.mxu1 %v3956_v35  ;;  %v3466_v21 = vadd.f32 %v5076_v37, %v486_v28 }
 0x158   :  { %v5083_v40 = vpop.f32.mrb[3].mxu1  ;;  %3454 = vmatprep.subr.bf16.mxu1 %v3957_v31  ;;  %v3468_v32 = vadd.f32 %v5078_v38, %v482_v27 }
 0x15b   :  { %3455 = vmatpush3.bf16.msra.mxu1 %v3958_v39  ;;  %v3470_v39 = vadd.f32 %v5083_v40, %v486_v28 }
 0x15c   :  { %3456 = vmatprep.subr.bf16.mxu1 %v3959_v41 }
 0x15f   :  { %3457 = vmatpush3.bf16.msra.mxu1 %v3960_v42 }
 0x162   :  { %2936 = vmatmul.mubr.bf16.vlgmr.msra.gmra.mrb[28].mxu1 %v3942_v23 }
 0x175   :  { %v3326_v43 = vpop.f32.mrb[4].mxu1 }
 0x176   :  { %v3327_v44 = vpop.f32.mrb[5].mxu1 }
 0x177   :  { %v3328_v45 = vadd.f32 %v3327_v44, %v3326_v43  ;;  %v3329_v46 = vpop.f32.mrb[6].mxu1 }
 0x178   :  { %v3330_v47 = vpop.f32.mrb[7].mxu1 }
 0x179   :  { %v3331_v49 = vadd.f32 %v3330_v47, %v3329_v46  ;;  %v2692_v34 = vadd.f32 %v3328_v45, %v490_v4 }
 0x17b   :  { %v2695_v59 = vadd.f32 %v3331_v49, %v490_v4 }
 0x195   :  { %v3348_v54 = vpop.f32.mrb[8].mxu1 }
 0x196   :  { %v3349_v55 = vpop.f32.mrb[9].mxu1 }
 0x197   :  { %v3350_v56 = vadd.f32 %v3349_v55, %v3348_v54  ;;  %v3351_v57 = vpop.f32.mrb[10].mxu1 }
 0x198   :  { %v3352_v58 = vpop.f32.mrb[11].mxu1 }
 0x199   :  { %v2733_v60 = vadd.f32 %v3350_v56, %v2692_v34  ;;  %v3353_v61 = vadd.f32 %v3352_v58, %v3351_v57 }
 0x19b   :  { %v2736_v12 = vadd.f32 %v3353_v61, %v2695_v59 }
 0x1b5   :  { %v3370_v62 = vpop.f32.mrb[12].mxu1 }
 0x1b6   :  { %v3371_v63 = vpop.f32.mrb[13].mxu1 }
 0x1b7   :  { %v3372_v0 = vadd.f32 %v3371_v63, %v3370_v62  ;;  %v3373_v24 = vpop.f32.mrb[14].mxu1 }
 0x1b8   :  { %v3374_v1 = vpop.f32.mrb[15].mxu1 }
 0x1b9   :  { %v2774_v2 = vadd.f32 %v3372_v0, %v2733_v60  ;;  %v3375_v3 = vadd.f32 %v3374_v1, %v3373_v24 }
 0x1bb   :  { %v2777_v5 = vadd.f32 %v3375_v3, %v2736_v12 }
 0x1d5   :  { %v3392_v6 = vpop.f32.mrb[16].mxu1 }
 0x1d6   :  { %v3393_v7 = vpop.f32.mrb[17].mxu1 }
 0x1d7   :  { %v3394_v8 = vadd.f32 %v3393_v7, %v3392_v6  ;;  %v3395_v10 = vpop.f32.mrb[18].mxu1 }
 0x1d8   :  { %v3396_v11 = vpop.f32.mrb[19].mxu1 }
 0x1d9   :  { %v2815_v13 = vadd.f32 %v3394_v8, %v2774_v2  ;;  %v3397_v14 = vadd.f32 %v3396_v11, %v3395_v10 }
 0x1db   :  { %v2818_v15 = vadd.f32 %v3397_v14, %v2777_v5 }
 0x1f5   :  { %v3414_v16 = vpop.f32.mrb[20].mxu1 }
 0x1f6   :  { %v3415_v17 = vpop.f32.mrb[21].mxu1 }
 0x1f7   :  { %v3416_v18 = vadd.f32 %v3415_v17, %v3414_v16  ;;  %v3417_v19 = vpop.f32.mrb[22].mxu1 }
 0x1f8   :  { %v3418_v20 = vpop.f32.mrb[23].mxu1 }
 0x1f9   :  { %v2856_v9 = vadd.f32 %v3416_v18, %v2815_v13  ;;  %v3419_v22 = vadd.f32 %v3418_v20, %v3417_v19 }
 0x1fb   :  { %v2859_v23 = vadd.f32 %v3419_v22, %v2818_v15 }
 0x215   :  { %v3436_v30 = vpop.f32.mrb[24].mxu1 }
 0x216   :  { %v2648_v26 = vpop.f32.mrb[0].mxu0  ;;  %v3437_v31 = vpop.f32.mrb[25].mxu1 }
 0x217   :  { %v3465_v33 = vadd.f32 %v3464_v29, %v2648_v26  ;;  %v2650_v35 = vpop.f32.mrb[1].mxu0  ;;  %v3438_v42 = vadd.f32 %v3437_v31, %v3436_v30  ;;  %v3439_v44 = vpop.f32.mrb[26].mxu1 }
 0x218   :  { %v3467_v41 = vadd.f32 %v3466_v21, %v2650_v35  ;;  %v2652_v43 = vpop.f32.mrb[2].mxu0  ;;  %v3440_v49 = vpop.f32.mrb[27].mxu1 }
 0x219   :  { %v2944_v45 = vmax.f32 %v3465_v33, 0.0  ;;  %v3469_v46 = vadd.f32 %v3468_v32, %v2652_v43  ;;  %v2654_v47 = vpop.f32.mrb[3].mxu0  ;;  %v2897_v50 = vadd.f32 %v3438_v42, %v2856_v9  ;;  %v3441_v51 = vadd.f32 %v3440_v49, %v3439_v44 }
 0x21a   :  { %v2945_v36 = vmax.f32 %v3467_v41, 0.0  ;;  %v3471_v37 = vadd.f32 %v3470_v39, %v2654_v47 }
 0x21b   :  { %2950 = vst [vmem:[%s5119_s3] sm:$0xff] %v2944_v45  ;;  %v2947_v38 = vmax.f32 %v3469_v46, 0.0  ;;  %v2900_v52 = vadd.f32 %v3441_v51, %v2859_v23 }
 0x21c   :  { %2951 = vst [vmem:[%s5119_s3 + $0x8] sm:$0xff] %v2945_v36  ;;  %v2948_v40 = vmax.f32 %v3471_v37, 0.0 }
 0x21d   :  { %2953 = vst [vmem:[%s5119_s3 + $0x18] sm:$0xff] %v2947_v38 }
 0x21e   :  { %2954 = vst [vmem:[%s5119_s3 + $0x20] sm:$0xff] %v2948_v40 }
 0x235   :  { %v3458_v53 = vpop.f32.mrb[28].mxu1 }
 0x236   :  { %v3459_v4 = vpop.f32.mrb[29].mxu1 }
 0x237   :  { %v3460_v54 = vadd.f32 %v3459_v4, %v3458_v53  ;;  %v3461_v55 = vpop.f32.mrb[30].mxu1 }
 0x238   :  { %v3462_v34 = vpop.f32.mrb[31].mxu1 }
 0x239   :  { %v2938_v56 = vadd.f32 %v3460_v54, %v2897_v50  ;;  %v3463_v57 = vadd.f32 %v3462_v34, %v3461_v55 }
 0x23b   :  { %v2946_v58 = vmax.f32 %v2938_v56, 0.0  ;;  %v2941_v59 = vadd.f32 %v3463_v57, %v2900_v52 }
 0x23d   :  { %2952 = vst [vmem:[%s5119_s3 + $0x10] sm:$0xff] %v2946_v58  ;;  %v2949_v60 = vmax.f32 %v2941_v59, 0.0 }
 0x23f   :  { %2955 = vst [vmem:[%s5119_s3 + $0x28] sm:$0xff] %v2949_v60 }

</bundles_post_ra>
